<compile_context>
chip_gen: v6e
topology: v6e:2x2x1
jax: 0.10.0
libtpu: 0.0.40
codegen_flags: <defaults>
</compile_context>

<pallas_src>
import math
import jax
import jax.numpy as jnp
from jax.experimental import pallas as pl
from jax.experimental.pallas import tpu as pltpu

# ---- hyper-params (small, consistent with the module structure) ----
X_DIM = 64      # x_dim
Y_DIM = 8       # y_dim
Z_DIM = 16      # z_dim
T_DIM = 2       # t_dim
H_DIM = 32      # hidden_dim
SUB = 8         # rows per ViVA batch (t-SNE couples rows within a sub-batch)
ZETA = 10.0
RHO = 0.5
NU = float(T_DIM - 1)
EPS = 1e-5
LOG2PI = math.log(2.0 * math.pi)
LANES = 128

_SUB_SHIFT = SUB.bit_length() - 1
assert (1 << _SUB_SHIFT) == SUB

# activation lane layout: [x | y | z | t | 1 | 0...]
Y_OFF, Z_OFF, T_OFF, ONE_OFF = 64, 72, 88, 90
H1 = H_DIM                      # hidden constant-1 column (bias fold for stage-B)

# slab blocks (each (128,128), packed into one (8,128,128) tensor)
IDX_EY1, IDX_EZ1, IDX_ET1, IDX_DEC, IDX_EY2, IDX_EZ2, IDX_ET2, IDX_DX2 = range(8)
NBLK = 8

# fused-decoder output lane layout: mu_pt | mu_pz | var_pt,var_pz | h_dx | 1
D_MUT, D_MUZ, D_SP, D_HDX, D_ONE = 0, 2, 18, 36, 68

# output lane layout
O_LOGITS, O_TMEAN, O_RECON, O_LATENT, O_TSNE = 0, 8, 10, 11, 12


def _mm(a, b):      # a @ b
    return jax.lax.dot_general(a, b, (((1,), (0,)), ((), ())),
                               preferred_element_type=jnp.float32)


def _mm_nt(a, b):   # a @ b.T  (no explicit transpose)
    return jax.lax.dot_general(a, b, (((1,), (1,)), ((), ())),
                               preferred_element_type=jnp.float32)


def _softplus(v):
    return jnp.maximum(v, 0.0) + jnp.log(1.0 + jnp.exp(-jnp.abs(v)))


def _normal_logprob_sum(v, mu, var):
    # torch.distributions.Normal(mu, sqrt(var)).log_prob(v).sum(1)
    return jnp.sum(-0.5 * (v - mu) ** 2 / var - 0.5 * jnp.log(var)
                   - 0.5 * LOG2PI, axis=1, keepdims=True)


def _t(mat):
    """Transpose of a square (M, M) tile (XLU for full tiles, MXU fallback)."""
    m = mat.shape[0]
    if m % 128 == 0:
        return jnp.transpose(mat)
    r = jax.lax.broadcasted_iota(jnp.int32, (m, m), 0)
    c = jax.lax.broadcasted_iota(jnp.int32, (m, m), 1)
    eye = (r == c).astype(jnp.float32)
    return _mm_nt(eye, mat)     # eye @ mat.T == mat.T


def viva_kernel(x_ref, slab_ref, out_ref):
    f32 = jnp.float32
    M = x_ref.shape[0]
    Y, Z, T = Y_DIM, Z_DIM, T_DIM
    lane = jax.lax.broadcasted_iota(jnp.int32, (M, LANES), 1)
    lane_f = lane.astype(f32)

    act = x_ref[...]                  # [x | 0 | 1@90 | 0...] packed host-side
    x = act[:, 0:X_DIM]

    # -------- encoder_y: Linear -> ReLU -> Linear, softmax stats --------
    h = jnp.maximum(_mm(act, slab_ref[IDX_EY1]), 0.0)   # hidden 0:32, 1 @ col 32
    logit_raw = _mm(h, slab_ref[IDX_EY2])                # logits at lanes 0:8
    lmask = jnp.where(lane < Y, logit_raw, -jnp.inf)
    mrow = jnp.max(lmask, axis=1, keepdims=True)
    e = jnp.exp(lmask - mrow)                            # 0 outside lanes 0:8
    srow = jnp.sum(e, axis=1, keepdims=True)
    lse = mrow + jnp.log(srow)
    logits_n = logit_raw - lse                           # normalized logits
    probs = e / srow
    neg_entropy = jnp.sum(probs * logits_n, axis=1, keepdims=True)

    # eval-mode y = one_hot(argmax(logits)), generated directly at lanes 64:72
    # TODO(synk): training-mode branches (gumbel-softmax rsample, Normal
    #             rsample, supervised-y path) are stochastic; eval path only.
    arg_y = jnp.min(jnp.where(lmask == mrow, lane_f, float(LANES)),
                    axis=1, keepdims=True)
    ymask = (lane >= Y_OFF) & (lane < Y_OFF + Y)
    y128 = jnp.where(ymask & ((lane_f - Y_OFF) == arg_y), 1.0, 0.0)
    act = act + y128

    # -------- encoder_z(x, y) --------
    h = jnp.maximum(_mm(act, slab_ref[IDX_EZ1]), 0.0)
    oz = _mm(h, slab_ref[IDX_EZ2])        # mu 0:16, var-pre 16:32, mu dup @72:88
    mu_z = oz[:, 0:Z]
    var_z = _softplus(oz[:, Z:2 * Z]) + EPS
    act = jnp.where((lane >= Z_OFF) & (lane < Z_OFF + Z), oz, act)   # z = mean

    # -------- encoder_t(x, y, z) --------
    h = jnp.maximum(_mm(act, slab_ref[IDX_ET1]), 0.0)
    ot = _mm(h, slab_ref[IDX_ET2])        # mu 0:2, var-pre 2:4, dup @8:10, @88:90
    mu_t = ot[:, 0:T]
    var_t = _softplus(ot[:, T:2 * T]) + EPS
    act = jnp.where((lane >= T_OFF) & (lane < T_OFF + T), ot, act)   # t = mean

    # -------- fused decoders: decoder_t | decoder_z | decoder_x layer-1 --------
    dec = _mm(act, slab_ref[IDX_DEC])
    mu_pt = dec[:, D_MUT:D_MUT + T]
    mu_pz = dec[:, D_MUZ:D_MUZ + Z]
    sp = _softplus(dec[:, D_SP:D_SP + T + Z]) + EPS      # [var_pt | var_pz]
    var_pt = sp[:, 0:T]
    var_pz = sp[:, T:T + Z]
    logit_x = _mm(jnp.maximum(dec, 0.0), slab_ref[IDX_DX2])
    lx = logit_x[:, 0:X_DIM]

    # -------- per-row losses --------
    lp_x = x * lx - _softplus(lx)                        # Bernoulli log_prob(x)
    recon_row = -jnp.sum(lp_x, axis=1, keepdims=True)

    lq_z = -0.5 * jnp.sum(jnp.log(var_z), axis=1, keepdims=True) - 0.5 * Z * LOG2PI
    lq_t = -0.5 * jnp.sum(jnp.log(var_t), axis=1, keepdims=True) - 0.5 * T * LOG2PI
    latent_row = (neg_entropy + math.log(Y)
                  - _normal_logprob_sum(mu_z, mu_pz, var_pz) + lq_z
                  - _normal_logprob_sum(mu_t, mu_pt, var_pt) + lq_t)

    # -------- block-diagonal t-SNE loss (each 8-row sub-batch independent) ----
    r_i = jax.lax.broadcasted_iota(jnp.int32, (M, M), 0)
    c_i = jax.lax.broadcasted_iota(jnp.int32, (M, M), 1)
    same_blk = (r_i >> _SUB_SHIFT) == (c_i >> _SUB_SHIFT)
    offd = same_blk & (r_i != c_i)
    blk_f = same_blk.astype(f32)
    offd_f = offd.astype(f32)

    inv_var = 1.0 / ((ZETA * ZETA) * var_z)              # exact reciprocal
    A = mu_z * inv_var
    t1 = jnp.sum(mu_z * A, axis=1, keepdims=True)
    dist = t1 - 2.0 * _mm_nt(A, mu_z) + _mm_nt(inv_var, mu_z * mu_z)

    eq = _mm_nt(y128, y128)                              # same-class indicator
    scale = 1.0 + RHO * (2.0 * eq - 1.0)
    neg_half = -0.5 * dist
    stab = jnp.max(jnp.where(offd, neg_half, -jnp.inf), axis=1, keepdims=True)
    p_den = jnp.exp(jnp.where(offd, neg_half - stab, 0.0)) * scale * offd_f
    P = p_den / jnp.sum(p_den, axis=1, keepdims=True)
    p_ij = (P + _t(P)) * (1.0 / (2.0 * SUB))

    dhalf = jnp.sum(mu_t * mu_t, axis=1, keepdims=True) - _mm_nt(mu_t, mu_t)
    dist_t = dhalf + _t(dhalf)
    if NU == 1.0:   # t_dim == 2: (d/nu + 1)^(-(nu+1)/2) == 1/(d+1)
        q_un = 1.0 / (dist_t + 1.0)
    else:
        q_un = jnp.exp(-(NU + 1.0) / 2.0 * jnp.log(dist_t / NU + 1.0))
    q_row = jnp.sum(q_un * offd_f, axis=1, keepdims=True)

    # per-sub-batch sums via one block-indicator matmul (broadcast to all rows)
    cols_a = (jnp.where(lane == 0, q_row, 0.0)
              + jnp.where(lane == O_RECON, recon_row, 0.0)
              + jnp.where(lane == O_LATENT, latent_row, 0.0))
    sums_a = _mm(blk_f, cols_a)
    q_tot = sums_a[:, 0:1]

    # KL(p || q) with xlogy semantics (target==0 -> 0), single fused log
    ratio = p_ij * q_tot / q_un
    valid = offd & (p_ij > 0.0)
    kl_el = jnp.where(valid, p_ij * jnp.log(jnp.where(valid, ratio, 1.0)), 0.0)
    kl_row = jnp.sum(kl_el, axis=1, keepdims=True)
    sums_b = _mm(blk_f, jnp.where(lane == O_TSNE, kl_row, 0.0))

    # -------- single lane-dense output store --------
    out = (jnp.where(lane < Y, logits_n, 0.0)
           + jnp.where((lane >= O_TMEAN) & (lane < O_TMEAN + T), ot, 0.0)
           + jnp.where((lane >= O_RECON) & (lane <= O_LATENT), sums_a, 0.0)
           + jnp.where(lane == O_TSNE, sums_b, 0.0))
    out_ref[...] = out


# ------------------------ host-side parameter packing ------------------------

def init_params(key):
    def xavier(k, fin, fout):
        std = math.sqrt(2.0 / (fin + fout))
        return jax.random.normal(k, (fin, fout), jnp.float32) * std

    ks = jax.random.split(key, 10)
    zeros = lambda n: jnp.zeros((n,), jnp.float32)
    p = {}
    p['ey_w1'] = xavier(ks[0], X_DIM, H_DIM);                 p['ey_b1'] = zeros(H_DIM)
    p['ey_w2'] = xavier(ks[1], H_DIM, Y_DIM);                 p['ey_b2'] = zeros(Y_DIM)
    p['ez_w1'] = xavier(ks[2], X_DIM + Y_DIM, H_DIM);         p['ez_b1'] = zeros(H_DIM)
    p['ez_w2'] = xavier(ks[3], H_DIM, 2 * Z_DIM);             p['ez_b2'] = zeros(2 * Z_DIM)
    p['et_w1'] = xavier(ks[4], X_DIM + Y_DIM + Z_DIM, H_DIM); p['et_b1'] = zeros(H_DIM)
    p['et_w2'] = xavier(ks[5], H_DIM, 2 * T_DIM);             p['et_b2'] = zeros(2 * T_DIM)
    p['dt_w'] = xavier(ks[6], Y_DIM, 2 * T_DIM);              p['dt_b'] = zeros(2 * T_DIM)
    p['dz_w'] = xavier(ks[7], Y_DIM + T_DIM, 2 * Z_DIM);      p['dz_b'] = zeros(2 * Z_DIM)
    p['dx_w1'] = xavier(ks[8], Y_DIM + Z_DIM + T_DIM, H_DIM); p['dx_b1'] = zeros(H_DIM)
    p['dx_w2'] = xavier(ks[9], H_DIM, X_DIM);                 p['dx_b2'] = zeros(X_DIM)
    return p


def pack_params(p):
    """Pack all weights/biases into one (8, 128, 128) f32 slab.

    Stage-A blocks: K=128 rows at the lane positions of their inputs, bias at
    the constant-1 row (ONE_OFF) and a 1.0 at column H1 (constant-1 hidden).
    Stage-B blocks: K=33 effective rows (bias at row H1); mu_z / mu_t columns
    are duplicated at the act / output lane positions they must land in."""
    H, Y, Z, T = H_DIM, Y_DIM, Z_DIM, T_DIM
    s = jnp.zeros((NBLK, LANES, LANES), jnp.float32)

    # stage-A encoder blocks
    s = s.at[IDX_EY1, 0:X_DIM, 0:H].set(p['ey_w1'])
    s = s.at[IDX_EY1, ONE_OFF, 0:H].set(p['ey_b1'])
    s = s.at[IDX_EY1, ONE_OFF, H1].set(1.0)
    s = s.at[IDX_EZ1, 0:X_DIM + Y, 0:H].set(p['ez_w1'])
    s = s.at[IDX_EZ1, ONE_OFF, 0:H].set(p['ez_b1'])
    s = s.at[IDX_EZ1, ONE_OFF, H1].set(1.0)
    s = s.at[IDX_ET1, 0:X_DIM + Y + Z, 0:H].set(p['et_w1'])
    s = s.at[IDX_ET1, ONE_OFF, 0:H].set(p['et_b1'])
    s = s.at[IDX_ET1, ONE_OFF, H1].set(1.0)

    # fused decoder stage-A: decoder_t | decoder_z | decoder_x layer-1
    s = s.at[IDX_DEC, Y_OFF:Y_OFF + Y, D_MUT:D_MUT + T].set(p['dt_w'][:, 0:T])
    s = s.at[IDX_DEC, Y_OFF:Y_OFF + Y, D_SP:D_SP + T].set(p['dt_w'][:, T:2 * T])
    s = s.at[IDX_DEC, ONE_OFF, D_MUT:D_MUT + T].set(p['dt_b'][0:T])
    s = s.at[IDX_DEC, ONE_OFF, D_SP:D_SP + T].set(p['dt_b'][T:2 * T])
    s = s.at[IDX_DEC, Y_OFF:Y_OFF + Y, D_MUZ:D_MUZ + Z].set(p['dz_w'][0:Y, 0:Z])
    s = s.at[IDX_DEC, T_OFF:T_OFF + T, D_MUZ:D_MUZ + Z].set(p['dz_w'][Y:Y + T, 0:Z])
    s = s.at[IDX_DEC, Y_OFF:Y_OFF + Y, D_SP + T:D_SP + T + Z].set(p['dz_w'][0:Y, Z:2 * Z])
    s = s.at[IDX_DEC, T_OFF:T_OFF + T, D_SP + T:D_SP + T + Z].set(p['dz_w'][Y:Y + T, Z:2 * Z])
    s = s.at[IDX_DEC, ONE_OFF, D_MUZ:D_MUZ + Z].set(p['dz_b'][0:Z])
    s = s.at[IDX_DEC, ONE_OFF, D_SP + T:D_SP + T + Z].set(p['dz_b'][Z:2 * Z])
    s = s.at[IDX_DEC, Y_OFF:Y_OFF + Y + Z + T, D_HDX:D_HDX + H].set(p['dx_w1'])
    s = s.at[IDX_DEC, ONE_OFF, D_HDX:D_HDX + H].set(p['dx_b1'])
    s = s.at[IDX_DEC, ONE_OFF, D_ONE].set(1.0)

    # stage-B blocks (bias folded via hidden constant-1 column H1)
    s = s.at[IDX_EY2, 0:H, 0:Y].set(p['ey_w2'])
    s = s.at[IDX_EY2, H1, 0:Y].set(p['ey_b2'])
    s = s.at[IDX_EZ2, 0:H, 0:2 * Z].set(p['ez_w2'])
    s = s.at[IDX_EZ2, H1, 0:2 * Z].set(p['ez_b2'])
    s = s.at[IDX_EZ2, 0:H, Z_OFF:Z_OFF + Z].set(p['ez_w2'][:, 0:Z])       # mu_z -> act lanes
    s = s.at[IDX_EZ2, H1, Z_OFF:Z_OFF + Z].set(p['ez_b2'][0:Z])
    s = s.at[IDX_ET2, 0:H, 0:2 * T].set(p['et_w2'])
    s = s.at[IDX_ET2, H1, 0:2 * T].set(p['et_b2'])
    s = s.at[IDX_ET2, 0:H, O_TMEAN:O_TMEAN + T].set(p['et_w2'][:, 0:T])   # mu_t -> output lanes
    s = s.at[IDX_ET2, H1, O_TMEAN:O_TMEAN + T].set(p['et_b2'][0:T])
    s = s.at[IDX_ET2, 0:H, T_OFF:T_OFF + T].set(p['et_w2'][:, 0:T])       # mu_t -> act lanes
    s = s.at[IDX_ET2, H1, T_OFF:T_OFF + T].set(p['et_b2'][0:T])
    # decoder_x layer-2 consumes relu(dec): hidden at lanes D_HDX.., 1 at D_ONE
    s = s.at[IDX_DX2, D_HDX:D_HDX + H, 0:X_DIM].set(p['dx_w2'])
    s = s.at[IDX_DX2, D_ONE, 0:X_DIM].set(p['dx_b2'])
    return s


# ------------------------------ wrappers ------------------------------

def _pack_x(x2d):
    """(rows, X_DIM) -> (rows, 128): x at lanes 0:64, 1.0 at lane ONE_OFF."""
    rows = x2d.shape[0]
    xp = jnp.zeros((rows, LANES), jnp.float32)
    xp = xp.at[:, 0:X_DIM].set(x2d.astype(jnp.float32))
    xp = xp.at[:, ONE_OFF].set(1.0)
    return xp


def _viva_pallas(x_packed, slab, m_block):
    rows = x_packed.shape[0]
    assert rows % m_block == 0 and m_block % SUB == 0
    return pl.pallas_call(
        viva_kernel,
        out_shape=jax.ShapeDtypeStruct((rows, LANES), jnp.float32),
        grid=(rows // m_block,),
        in_specs=[pl.BlockSpec((m_block, LANES), lambda i: (i, 0)),
                  pl.BlockSpec((NBLK, LANES, LANES), lambda i: (0, 0, 0))],
        out_specs=pl.BlockSpec((m_block, LANES), lambda i: (i, 0)),
        compiler_params=pltpu.CompilerParams(
            dimension_semantics=("parallel",)),
    )(x_packed, slab)


@jax.jit
def mnist_viva_forward(x, slab):
    """Single batch (SUB, X_DIM); returns the 5 module outputs."""
    out = _viva_pallas(_pack_x(x), slab, SUB)
    return (out[0, O_RECON],
            out[:, O_LOGITS:O_LOGITS + Y_DIM],
            out[:, O_TMEAN:O_TMEAN + T_DIM],
            out[0, O_LATENT],
            out[0, O_TSNE])


@jax.jit
def mnist_viva_forward_batched(xs, slab):
    """Many independent 8-row batches: xs (NB, SUB, X_DIM)."""
    nb = xs.shape[0]
    m_block = SUB * math.gcd(nb, 16)       # up to 16 sub-batches (128 rows)/step
    out = _viva_pallas(_pack_x(xs.reshape(nb * SUB, X_DIM)), slab, m_block)
    o = out.reshape(nb, SUB, LANES)
    return (o[:, 0, O_RECON],
            o[:, :, O_LOGITS:O_LOGITS + Y_DIM],
            o[:, :, O_TMEAN:O_TMEAN + T_DIM],
            o[:, 0, O_LATENT],
            o[:, 0, O_TSNE])


if __name__ == "__main__":
    key = jax.random.PRNGKey(0)
    kp, kx1, kx2 = jax.random.split(key, 3)
    slab = pack_params(init_params(kp))

    # single 8-row batch (matches the module's forward on one mini-batch)
    x = jax.random.uniform(kx1, (SUB, X_DIM), dtype=jnp.float32)
    outs = mnist_viva_forward(x, slab)
    jax.block_until_ready(outs)

    # 32 independent 8-row batches -> 256 rows -> two (128,128) grid steps,
    # marked "parallel" so they can shard across both v7x TensorCores.
    xs = jax.random.uniform(kx2, (32, SUB, X_DIM), dtype=jnp.float32)
    outs_b = mnist_viva_forward_batched(xs, slab)
    jax.block_until_ready(outs_b)

    print("KERNEL_OK")
</pallas_src>

<mosaic_0001>
module attributes {stable_mosaic.version = 11 : i64} {
  func.func @viva_kernel(%arg0: i32, %arg1: memref<8x128xf32, #tpu.memory_space<vmem>>, %arg2: memref<8x128x128xf32, #tpu.memory_space<vmem>>, %arg3: memref<8x128xf32, #tpu.memory_space<vmem>>) attributes {dimension_semantics = [#tpu.dimension_semantics<parallel>], iteration_bounds = array<i64: 1>, scalar_prefetch = 0 : i64, scratch_operands = 0 : i64, tpu.core_type = #tpu.core_type<tc>, window_params = [{transform_indices = @transform_0, window_bounds = array<i64: 8, 128>}, {pipeline_mode = #tpu.pipeline_mode<synchronous>, transform_indices = @transform_1, window_bounds = array<i64: 8, 128, 128>}, {transform_indices = @transform_2, window_bounds = array<i64: 8, 128>}]} {
    %0 = tpu.iota {dimensions = array<i32: 1>} : vector<8x128xi32>
    %1 = arith.sitofp %0 : vector<8x128xi32> to vector<8x128xf32>
    %c0 = arith.constant 0 : index
    %c0_0 = arith.constant 0 : index
    %2 = vector.load %arg1[%c0, %c0_0] : memref<8x128xf32, #tpu.memory_space<vmem>>, vector<8x128xf32>
    %3 = vector.extract_strided_slice %2 {offsets = [0, 0], sizes = [8, 64], strides = [1, 1]} : vector<8x128xf32> to vector<8x64xf32>
    %c0_1 = arith.constant 0 : index
    %c0_2 = arith.constant 0 : index
    %c0_3 = arith.constant 0 : index
    %4 = vector.load %arg2[%c0_1, %c0_2, %c0_3] : memref<8x128x128xf32, #tpu.memory_space<vmem>>, vector<1x128x128xf32>
    %5 = vector.shape_cast %4 : vector<1x128x128xf32> to vector<128x128xf32>
    %cst = arith.constant dense<0.000000e+00> : vector<8x128xf32>
    %6 = tpu.matmul %2, %5, %cst {dimension_numbers = #tpu.dot_dimension_numbers<[1], [0], [0], [1], [0, 0, 1, 1], [], []>} : vector<8x128xf32>, vector<128x128xf32>, vector<8x128xf32> -> vector<8x128xf32>
    %cst_4 = arith.constant 0.000000e+00 : f32
    %7 = vector.broadcast %cst_4 : f32 to vector<8x128xf32>
    %8 = arith.maximumf %6, %7 : vector<8x128xf32>
    %c4 = arith.constant 4 : index
    %c0_5 = arith.constant 0 : index
    %c0_6 = arith.constant 0 : index
    %9 = vector.load %arg2[%c4, %c0_5, %c0_6] : memref<8x128x128xf32, #tpu.memory_space<vmem>>, vector<1x128x128xf32>
    %10 = vector.shape_cast %9 : vector<1x128x128xf32> to vector<128x128xf32>
    %cst_7 = arith.constant dense<0.000000e+00> : vector<8x128xf32>
    %11 = tpu.matmul %8, %10, %cst_7 {dimension_numbers = #tpu.dot_dimension_numbers<[1], [0], [0], [1], [0, 0, 1, 1], [], []>} : vector<8x128xf32>, vector<128x128xf32>, vector<8x128xf32> -> vector<8x128xf32>
    %c8_i32 = arith.constant 8 : i32
    %12 = vector.broadcast %c8_i32 : i32 to vector<8x128xi32>
    %13 = arith.cmpi slt, %0, %12 : vector<8x128xi32>
    %cst_8 = arith.constant 0xFF800000 : f32
    %14 = vector.broadcast %cst_8 : f32 to vector<8x128xf32>
    %15 = arith.select %13, %11, %14 : vector<8x128xi1>, vector<8x128xf32>
    %cst_9 = arith.constant dense<0xFF800000> : vector<8xf32>
    %16 = vector.multi_reduction <maximumf>, %15, %cst_9 [1] : vector<8x128xf32> to vector<8xf32>
    %17 = vector.shape_cast %16 : vector<8xf32> to vector<8x1xf32>
    %18 = vector.broadcast %17 : vector<8x1xf32> to vector<8x128xf32>
    %19 = arith.subf %15, %18 : vector<8x128xf32>
    %20 = math.exp %19 : vector<8x128xf32>
    %cst_10 = arith.constant dense<0.000000e+00> : vector<8xf32>
    %21 = vector.multi_reduction <add>, %20, %cst_10 [1] : vector<8x128xf32> to vector<8xf32>
    %22 = vector.shape_cast %21 : vector<8xf32> to vector<8x1xf32>
    %23 = math.log %22 : vector<8x1xf32>
    %24 = arith.addf %17, %23 : vector<8x1xf32>
    %25 = vector.broadcast %24 : vector<8x1xf32> to vector<8x128xf32>
    %26 = arith.subf %11, %25 : vector<8x128xf32>
    %27 = vector.broadcast %22 : vector<8x1xf32> to vector<8x128xf32>
    %28 = arith.divf %20, %27 : vector<8x128xf32>
    %29 = arith.mulf %28, %26 : vector<8x128xf32>
    %cst_11 = arith.constant dense<0.000000e+00> : vector<8xf32>
    %30 = vector.multi_reduction <add>, %29, %cst_11 [1] : vector<8x128xf32> to vector<8xf32>
    %31 = vector.shape_cast %30 : vector<8xf32> to vector<8x1xf32>
    %32 = vector.broadcast %17 : vector<8x1xf32> to vector<8x128xf32>
    %33 = arith.cmpf oeq, %15, %32 : vector<8x128xf32>
    %cst_12 = arith.constant 1.280000e+02 : f32
    %34 = vector.broadcast %cst_12 : f32 to vector<8x128xf32>
    %35 = arith.select %33, %1, %34 : vector<8x128xi1>, vector<8x128xf32>
    %cst_13 = arith.constant dense<0x7F800000> : vector<8xf32>
    %36 = vector.multi_reduction <minimumf>, %35, %cst_13 [1] : vector<8x128xf32> to vector<8xf32>
    %37 = vector.shape_cast %36 : vector<8xf32> to vector<8x1xf32>
    %c64_i32 = arith.constant 64 : i32
    %38 = vector.broadcast %c64_i32 : i32 to vector<8x128xi32>
    %39 = arith.cmpi sge, %0, %38 : vector<8x128xi32>
    %c72_i32 = arith.constant 72 : i32
    %40 = vector.broadcast %c72_i32 : i32 to vector<8x128xi32>
    %41 = arith.cmpi slt, %0, %40 : vector<8x128xi32>
    %42 = arith.andi %39, %41 : vector<8x128xi1>
    %cst_14 = arith.constant 6.400000e+01 : f32
    %43 = vector.broadcast %cst_14 : f32 to vector<8x128xf32>
    %44 = arith.subf %1, %43 : vector<8x128xf32>
    %45 = vector.broadcast %37 : vector<8x1xf32> to vector<8x128xf32>
    %46 = arith.cmpf oeq, %44, %45 : vector<8x128xf32>
    %47 = arith.andi %42, %46 : vector<8x128xi1>
    %cst_15 = arith.constant 1.000000e+00 : f32
    %cst_16 = arith.constant 0.000000e+00 : f32
    %48 = vector.broadcast %cst_15 : f32 to vector<8x128xf32>
    %49 = vector.broadcast %cst_16 : f32 to vector<8x128xf32>
    %50 = arith.select %47, %48, %49 : vector<8x128xi1>, vector<8x128xf32>
    %51 = arith.addf %2, %50 : vector<8x128xf32>
    %c1 = arith.constant 1 : index
    %c0_17 = arith.constant 0 : index
    %c0_18 = arith.constant 0 : index
    %52 = vector.load %arg2[%c1, %c0_17, %c0_18] : memref<8x128x128xf32, #tpu.memory_space<vmem>>, vector<1x128x128xf32>
    %53 = vector.shape_cast %52 : vector<1x128x128xf32> to vector<128x128xf32>
    %cst_19 = arith.constant dense<0.000000e+00> : vector<8x128xf32>
    %54 = tpu.matmul %51, %53, %cst_19 {dimension_numbers = #tpu.dot_dimension_numbers<[1], [0], [0], [1], [0, 0, 1, 1], [], []>} : vector<8x128xf32>, vector<128x128xf32>, vector<8x128xf32> -> vector<8x128xf32>
    %cst_20 = arith.constant 0.000000e+00 : f32
    %55 = vector.broadcast %cst_20 : f32 to vector<8x128xf32>
    %56 = arith.maximumf %54, %55 : vector<8x128xf32>
    %c5 = arith.constant 5 : index
    %c0_21 = arith.constant 0 : index
    %c0_22 = arith.constant 0 : index
    %57 = vector.load %arg2[%c5, %c0_21, %c0_22] : memref<8x128x128xf32, #tpu.memory_space<vmem>>, vector<1x128x128xf32>
    %58 = vector.shape_cast %57 : vector<1x128x128xf32> to vector<128x128xf32>
    %cst_23 = arith.constant dense<0.000000e+00> : vector<8x128xf32>
    %59 = tpu.matmul %56, %58, %cst_23 {dimension_numbers = #tpu.dot_dimension_numbers<[1], [0], [0], [1], [0, 0, 1, 1], [], []>} : vector<8x128xf32>, vector<128x128xf32>, vector<8x128xf32> -> vector<8x128xf32>
    %60 = vector.extract_strided_slice %59 {offsets = [0, 0], sizes = [8, 16], strides = [1, 1]} : vector<8x128xf32> to vector<8x16xf32>
    %61 = vector.extract_strided_slice %59 {offsets = [0, 16], sizes = [8, 16], strides = [1, 1]} : vector<8x128xf32> to vector<8x16xf32>
    %cst_24 = arith.constant 0.000000e+00 : f32
    %62 = vector.broadcast %cst_24 : f32 to vector<8x16xf32>
    %63 = arith.maximumf %61, %62 : vector<8x16xf32>
    %64 = math.absf %61 : vector<8x16xf32>
    %cst_25 = arith.constant 0.000000e+00 : f32
    %65 = vector.broadcast %cst_25 : f32 to vector<8x16xf32>
    %66 = arith.subf %65, %64 : vector<8x16xf32>
    %67 = math.exp %66 : vector<8x16xf32>
    %cst_26 = arith.constant 1.000000e+00 : f32
    %68 = vector.broadcast %cst_26 : f32 to vector<8x16xf32>
    %69 = arith.addf %68, %67 : vector<8x16xf32>
    %70 = math.log %69 : vector<8x16xf32>
    %71 = arith.addf %63, %70 : vector<8x16xf32>
    %cst_27 = arith.constant 9.99999974E-6 : f32
    %72 = vector.broadcast %cst_27 : f32 to vector<8x16xf32>
    %73 = arith.addf %71, %72 : vector<8x16xf32>
    %c72_i32_28 = arith.constant 72 : i32
    %74 = vector.broadcast %c72_i32_28 : i32 to vector<8x128xi32>
    %75 = arith.cmpi sge, %0, %74 : vector<8x128xi32>
    %c88_i32 = arith.constant 88 : i32
    %76 = vector.broadcast %c88_i32 : i32 to vector<8x128xi32>
    %77 = arith.cmpi slt, %0, %76 : vector<8x128xi32>
    %78 = arith.andi %75, %77 : vector<8x128xi1>
    %79 = arith.select %78, %59, %51 : vector<8x128xi1>, vector<8x128xf32>
    %c2 = arith.constant 2 : index
    %c0_29 = arith.constant 0 : index
    %c0_30 = arith.constant 0 : index
    %80 = vector.load %arg2[%c2, %c0_29, %c0_30] : memref<8x128x128xf32, #tpu.memory_space<vmem>>, vector<1x128x128xf32>
    %81 = vector.shape_cast %80 : vector<1x128x128xf32> to vector<128x128xf32>
    %cst_31 = arith.constant dense<0.000000e+00> : vector<8x128xf32>
    %82 = tpu.matmul %79, %81, %cst_31 {dimension_numbers = #tpu.dot_dimension_numbers<[1], [0], [0], [1], [0, 0, 1, 1], [], []>} : vector<8x128xf32>, vector<128x128xf32>, vector<8x128xf32> -> vector<8x128xf32>
    %cst_32 = arith.constant 0.000000e+00 : f32
    %83 = vector.broadcast %cst_32 : f32 to vector<8x128xf32>
    %84 = arith.maximumf %82, %83 : vector<8x128xf32>
    %c6 = arith.constant 6 : index
    %c0_33 = arith.constant 0 : index
    %c0_34 = arith.constant 0 : index
    %85 = vector.load %arg2[%c6, %c0_33, %c0_34] : memref<8x128x128xf32, #tpu.memory_space<vmem>>, vector<1x128x128xf32>
    %86 = vector.shape_cast %85 : vector<1x128x128xf32> to vector<128x128xf32>
    %cst_35 = arith.constant dense<0.000000e+00> : vector<8x128xf32>
    %87 = tpu.matmul %84, %86, %cst_35 {dimension_numbers = #tpu.dot_dimension_numbers<[1], [0], [0], [1], [0, 0, 1, 1], [], []>} : vector<8x128xf32>, vector<128x128xf32>, vector<8x128xf32> -> vector<8x128xf32>
    %88 = vector.extract_strided_slice %87 {offsets = [0, 0], sizes = [8, 2], strides = [1, 1]} : vector<8x128xf32> to vector<8x2xf32>
    %89 = vector.extract_strided_slice %87 {offsets = [0, 2], sizes = [8, 2], strides = [1, 1]} : vector<8x128xf32> to vector<8x2xf32>
    %cst_36 = arith.constant 0.000000e+00 : f32
    %90 = vector.broadcast %cst_36 : f32 to vector<8x2xf32>
    %91 = arith.maximumf %89, %90 : vector<8x2xf32>
    %92 = math.absf %89 : vector<8x2xf32>
    %cst_37 = arith.constant 0.000000e+00 : f32
    %93 = vector.broadcast %cst_37 : f32 to vector<8x2xf32>
    %94 = arith.subf %93, %92 : vector<8x2xf32>
    %95 = math.exp %94 : vector<8x2xf32>
    %cst_38 = arith.constant 1.000000e+00 : f32
    %96 = vector.broadcast %cst_38 : f32 to vector<8x2xf32>
    %97 = arith.addf %96, %95 : vector<8x2xf32>
    %98 = math.log %97 : vector<8x2xf32>
    %99 = arith.addf %91, %98 : vector<8x2xf32>
    %cst_39 = arith.constant 9.99999974E-6 : f32
    %100 = vector.broadcast %cst_39 : f32 to vector<8x2xf32>
    %101 = arith.addf %99, %100 : vector<8x2xf32>
    %c88_i32_40 = arith.constant 88 : i32
    %102 = vector.broadcast %c88_i32_40 : i32 to vector<8x128xi32>
    %103 = arith.cmpi sge, %0, %102 : vector<8x128xi32>
    %c90_i32 = arith.constant 90 : i32
    %104 = vector.broadcast %c90_i32 : i32 to vector<8x128xi32>
    %105 = arith.cmpi slt, %0, %104 : vector<8x128xi32>
    %106 = arith.andi %103, %105 : vector<8x128xi1>
    %107 = arith.select %106, %87, %79 : vector<8x128xi1>, vector<8x128xf32>
    %c3 = arith.constant 3 : index
    %c0_41 = arith.constant 0 : index
    %c0_42 = arith.constant 0 : index
    %108 = vector.load %arg2[%c3, %c0_41, %c0_42] : memref<8x128x128xf32, #tpu.memory_space<vmem>>, vector<1x128x128xf32>
    %109 = vector.shape_cast %108 : vector<1x128x128xf32> to vector<128x128xf32>
    %cst_43 = arith.constant dense<0.000000e+00> : vector<8x128xf32>
    %110 = tpu.matmul %107, %109, %cst_43 {dimension_numbers = #tpu.dot_dimension_numbers<[1], [0], [0], [1], [0, 0, 1, 1], [], []>} : vector<8x128xf32>, vector<128x128xf32>, vector<8x128xf32> -> vector<8x128xf32>
    %111 = vector.extract_strided_slice %110 {offsets = [0, 0], sizes = [8, 2], strides = [1, 1]} : vector<8x128xf32> to vector<8x2xf32>
    %112 = vector.extract_strided_slice %110 {offsets = [0, 2], sizes = [8, 16], strides = [1, 1]} : vector<8x128xf32> to vector<8x16xf32>
    %113 = vector.extract_strided_slice %110 {offsets = [0, 18], sizes = [8, 18], strides = [1, 1]} : vector<8x128xf32> to vector<8x18xf32>
    %cst_44 = arith.constant 0.000000e+00 : f32
    %114 = vector.broadcast %cst_44 : f32 to vector<8x18xf32>
    %115 = arith.maximumf %113, %114 : vector<8x18xf32>
    %116 = math.absf %113 : vector<8x18xf32>
    %cst_45 = arith.constant 0.000000e+00 : f32
    %117 = vector.broadcast %cst_45 : f32 to vector<8x18xf32>
    %118 = arith.subf %117, %116 : vector<8x18xf32>
    %119 = math.exp %118 : vector<8x18xf32>
    %cst_46 = arith.constant 1.000000e+00 : f32
    %120 = vector.broadcast %cst_46 : f32 to vector<8x18xf32>
    %121 = arith.addf %120, %119 : vector<8x18xf32>
    %122 = math.log %121 : vector<8x18xf32>
    %123 = arith.addf %115, %122 : vector<8x18xf32>
    %cst_47 = arith.constant 9.99999974E-6 : f32
    %124 = vector.broadcast %cst_47 : f32 to vector<8x18xf32>
    %125 = arith.addf %123, %124 : vector<8x18xf32>
    %126 = vector.extract_strided_slice %125 {offsets = [0, 0], sizes = [8, 2], strides = [1, 1]} : vector<8x18xf32> to vector<8x2xf32>
    %127 = vector.extract_strided_slice %125 {offsets = [0, 2], sizes = [8, 16], strides = [1, 1]} : vector<8x18xf32> to vector<8x16xf32>
    %cst_48 = arith.constant 0.000000e+00 : f32
    %128 = vector.broadcast %cst_48 : f32 to vector<8x128xf32>
    %129 = arith.maximumf %110, %128 : vector<8x128xf32>
    %c7 = arith.constant 7 : index
    %c0_49 = arith.constant 0 : index
    %c0_50 = arith.constant 0 : index
    %130 = vector.load %arg2[%c7, %c0_49, %c0_50] : memref<8x128x128xf32, #tpu.memory_space<vmem>>, vector<1x128x128xf32>
    %131 = vector.shape_cast %130 : vector<1x128x128xf32> to vector<128x128xf32>
    %cst_51 = arith.constant dense<0.000000e+00> : vector<8x128xf32>
    %132 = tpu.matmul %129, %131, %cst_51 {dimension_numbers = #tpu.dot_dimension_numbers<[1], [0], [0], [1], [0, 0, 1, 1], [], []>} : vector<8x128xf32>, vector<128x128xf32>, vector<8x128xf32> -> vector<8x128xf32>
    %133 = vector.extract_strided_slice %132 {offsets = [0, 0], sizes = [8, 64], strides = [1, 1]} : vector<8x128xf32> to vector<8x64xf32>
    %134 = arith.mulf %3, %133 : vector<8x64xf32>
    %cst_52 = arith.constant 0.000000e+00 : f32
    %135 = vector.broadcast %cst_52 : f32 to vector<8x64xf32>
    %136 = arith.maximumf %133, %135 : vector<8x64xf32>
    %137 = math.absf %133 : vector<8x64xf32>
    %cst_53 = arith.constant 0.000000e+00 : f32
    %138 = vector.broadcast %cst_53 : f32 to vector<8x64xf32>
    %139 = arith.subf %138, %137 : vector<8x64xf32>
    %140 = math.exp %139 : vector<8x64xf32>
    %cst_54 = arith.constant 1.000000e+00 : f32
    %141 = vector.broadcast %cst_54 : f32 to vector<8x64xf32>
    %142 = arith.addf %141, %140 : vector<8x64xf32>
    %143 = math.log %142 : vector<8x64xf32>
    %144 = arith.addf %136, %143 : vector<8x64xf32>
    %145 = arith.subf %134, %144 : vector<8x64xf32>
    %cst_55 = arith.constant dense<0.000000e+00> : vector<8xf32>
    %146 = vector.multi_reduction <add>, %145, %cst_55 [1] : vector<8x64xf32> to vector<8xf32>
    %147 = vector.shape_cast %146 : vector<8xf32> to vector<8x1xf32>
    %cst_56 = arith.constant 0.000000e+00 : f32
    %148 = vector.broadcast %cst_56 : f32 to vector<8x1xf32>
    %149 = arith.subf %148, %147 : vector<8x1xf32>
    %150 = math.log %73 : vector<8x16xf32>
    %cst_57 = arith.constant dense<0.000000e+00> : vector<8xf32>
    %151 = vector.multi_reduction <add>, %150, %cst_57 [1] : vector<8x16xf32> to vector<8xf32>
    %152 = vector.shape_cast %151 : vector<8xf32> to vector<8x1xf32>
    %cst_58 = arith.constant -5.000000e-01 : f32
    %153 = vector.broadcast %cst_58 : f32 to vector<8x1xf32>
    %154 = arith.mulf %153, %152 : vector<8x1xf32>
    %cst_59 = arith.constant 14.7030163 : f32
    %155 = vector.broadcast %cst_59 : f32 to vector<8x1xf32>
    %156 = arith.subf %154, %155 : vector<8x1xf32>
    %157 = math.log %101 : vector<8x2xf32>
    %cst_60 = arith.constant dense<0.000000e+00> : vector<8xf32>
    %158 = vector.multi_reduction <add>, %157, %cst_60 [1] : vector<8x2xf32> to vector<8xf32>
    %159 = vector.shape_cast %158 : vector<8xf32> to vector<8x1xf32>
    %cst_61 = arith.constant -5.000000e-01 : f32
    %160 = vector.broadcast %cst_61 : f32 to vector<8x1xf32>
    %161 = arith.mulf %160, %159 : vector<8x1xf32>
    %cst_62 = arith.constant 1.83787704 : f32
    %162 = vector.broadcast %cst_62 : f32 to vector<8x1xf32>
    %163 = arith.subf %161, %162 : vector<8x1xf32>
    %cst_63 = arith.constant 2.07944155 : f32
    %164 = vector.broadcast %cst_63 : f32 to vector<8x1xf32>
    %165 = arith.addf %31, %164 : vector<8x1xf32>
    %166 = arith.subf %60, %112 : vector<8x16xf32>
    %167 = arith.mulf %166, %166 : vector<8x16xf32>
    %cst_64 = arith.constant -5.000000e-01 : f32
    %168 = vector.broadcast %cst_64 : f32 to vector<8x16xf32>
    %169 = arith.mulf %168, %167 : vector<8x16xf32>
    %170 = arith.divf %169, %127 : vector<8x16xf32>
    %171 = math.log %127 : vector<8x16xf32>
    %cst_65 = arith.constant 5.000000e-01 : f32
    %172 = vector.broadcast %cst_65 : f32 to vector<8x16xf32>
    %173 = arith.mulf %172, %171 : vector<8x16xf32>
    %174 = arith.subf %170, %173 : vector<8x16xf32>
    %cst_66 = arith.constant 0.918938517 : f32
    %175 = vector.broadcast %cst_66 : f32 to vector<8x16xf32>
    %176 = arith.subf %174, %175 : vector<8x16xf32>
    %cst_67 = arith.constant dense<0.000000e+00> : vector<8xf32>
    %177 = vector.multi_reduction <add>, %176, %cst_67 [1] : vector<8x16xf32> to vector<8xf32>
    %178 = vector.shape_cast %177 : vector<8xf32> to vector<8x1xf32>
    %179 = arith.subf %165, %178 : vector<8x1xf32>
    %180 = arith.addf %179, %156 : vector<8x1xf32>
    %181 = arith.subf %88, %111 : vector<8x2xf32>
    %182 = arith.mulf %181, %181 : vector<8x2xf32>
    %cst_68 = arith.constant -5.000000e-01 : f32
    %183 = vector.broadcast %cst_68 : f32 to vector<8x2xf32>
    %184 = arith.mulf %183, %182 : vector<8x2xf32>
    %185 = arith.divf %184, %126 : vector<8x2xf32>
    %186 = math.log %126 : vector<8x2xf32>
    %cst_69 = arith.constant 5.000000e-01 : f32
    %187 = vector.broadcast %cst_69 : f32 to vector<8x2xf32>
    %188 = arith.mulf %187, %186 : vector<8x2xf32>
    %189 = arith.subf %185, %188 : vector<8x2xf32>
    %cst_70 = arith.constant 0.918938517 : f32
    %190 = vector.broadcast %cst_70 : f32 to vector<8x2xf32>
    %191 = arith.subf %189, %190 : vector<8x2xf32>
    %cst_71 = arith.constant dense<0.000000e+00> : vector<8xf32>
    %192 = vector.multi_reduction <add>, %191, %cst_71 [1] : vector<8x2xf32> to vector<8xf32>
    %193 = vector.shape_cast %192 : vector<8xf32> to vector<8x1xf32>
    %194 = arith.subf %180, %193 : vector<8x1xf32>
    %195 = arith.addf %194, %163 : vector<8x1xf32>
    %196 = tpu.iota {dimensions = array<i32: 0>} : vector<8x8xi32>
    %197 = tpu.iota {dimensions = array<i32: 1>} : vector<8x8xi32>
    %c3_i32 = arith.constant 3 : i32
    %198 = vector.broadcast %c3_i32 : i32 to vector<8x8xi32>
    %199 = arith.shrsi %196, %198 : vector<8x8xi32>
    %c3_i32_72 = arith.constant 3 : i32
    %200 = vector.broadcast %c3_i32_72 : i32 to vector<8x8xi32>
    %201 = arith.shrsi %197, %200 : vector<8x8xi32>
    %202 = arith.cmpi eq, %199, %201 : vector<8x8xi32>
    %203 = arith.cmpi ne, %196, %197 : vector<8x8xi32>
    %204 = arith.andi %202, %203 : vector<8x8xi1>
    %205 = arith.extui %202 : vector<8x8xi1> to vector<8x8xi32>
    %206 = arith.sitofp %205 : vector<8x8xi32> to vector<8x8xf32>
    %207 = arith.extui %204 : vector<8x8xi1> to vector<8x8xi32>
    %208 = arith.sitofp %207 : vector<8x8xi32> to vector<8x8xf32>
    %cst_73 = arith.constant 1.000000e+02 : f32
    %209 = vector.broadcast %cst_73 : f32 to vector<8x16xf32>
    %210 = arith.mulf %209, %73 : vector<8x16xf32>
    %cst_74 = arith.constant 1.000000e+00 : f32
    %211 = vector.broadcast %cst_74 : f32 to vector<8x16xf32>
    %212 = arith.divf %211, %210 : vector<8x16xf32>
    %213 = arith.mulf %60, %212 : vector<8x16xf32>
    %214 = arith.mulf %60, %213 : vector<8x16xf32>
    %cst_75 = arith.constant dense<0.000000e+00> : vector<8xf32>
    %215 = vector.multi_reduction <add>, %214, %cst_75 [1] : vector<8x16xf32> to vector<8xf32>
    %216 = vector.shape_cast %215 : vector<8xf32> to vector<8x1xf32>
    %cst_76 = arith.constant dense<0.000000e+00> : vector<8x8xf32>
    %217 = tpu.matmul %213, %60, %cst_76 {dimension_numbers = #tpu.dot_dimension_numbers<[1], [1], [0], [0], [0, 0, 1, 0], [], []>} : vector<8x16xf32>, vector<8x16xf32>, vector<8x8xf32> -> vector<8x8xf32>
    %cst_77 = arith.constant 2.000000e+00 : f32
    %218 = vector.broadcast %cst_77 : f32 to vector<8x8xf32>
    %219 = arith.mulf %218, %217 : vector<8x8xf32>
    %220 = vector.broadcast %216 : vector<8x1xf32> to vector<8x8xf32>
    %221 = arith.subf %220, %219 : vector<8x8xf32>
    %222 = arith.mulf %60, %60 : vector<8x16xf32>
    %cst_78 = arith.constant dense<0.000000e+00> : vector<8x8xf32>
    %223 = tpu.matmul %212, %222, %cst_78 {dimension_numbers = #tpu.dot_dimension_numbers<[1], [1], [0], [0], [0, 0, 1, 0], [], []>} : vector<8x16xf32>, vector<8x16xf32>, vector<8x8xf32> -> vector<8x8xf32>
    %224 = arith.addf %221, %223 : vector<8x8xf32>
    %cst_79 = arith.constant dense<0.000000e+00> : vector<8x8xf32>
    %225 = tpu.matmul %50, %50, %cst_79 {dimension_numbers = #tpu.dot_dimension_numbers<[1], [1], [0], [0], [0, 0, 1, 0], [], []>} : vector<8x128xf32>, vector<8x128xf32>, vector<8x8xf32> -> vector<8x8xf32>
    %cst_80 = arith.constant 2.000000e+00 : f32
    %226 = vector.broadcast %cst_80 : f32 to vector<8x8xf32>
    %227 = arith.mulf %226, %225 : vector<8x8xf32>
    %cst_81 = arith.constant 1.000000e+00 : f32
    %228 = vector.broadcast %cst_81 : f32 to vector<8x8xf32>
    %229 = arith.subf %227, %228 : vector<8x8xf32>
    %cst_82 = arith.constant 5.000000e-01 : f32
    %230 = vector.broadcast %cst_82 : f32 to vector<8x8xf32>
    %231 = arith.mulf %230, %229 : vector<8x8xf32>
    %cst_83 = arith.constant 1.000000e+00 : f32
    %232 = vector.broadcast %cst_83 : f32 to vector<8x8xf32>
    %233 = arith.addf %232, %231 : vector<8x8xf32>
    %cst_84 = arith.constant -5.000000e-01 : f32
    %234 = vector.broadcast %cst_84 : f32 to vector<8x8xf32>
    %235 = arith.mulf %234, %224 : vector<8x8xf32>
    %cst_85 = arith.constant 0xFF800000 : f32
    %236 = vector.broadcast %cst_85 : f32 to vector<8x8xf32>
    %237 = arith.select %204, %235, %236 : vector<8x8xi1>, vector<8x8xf32>
    %cst_86 = arith.constant dense<0xFF800000> : vector<8xf32>
    %238 = vector.multi_reduction <maximumf>, %237, %cst_86 [1] : vector<8x8xf32> to vector<8xf32>
    %239 = vector.shape_cast %238 : vector<8xf32> to vector<8x1xf32>
    %240 = vector.broadcast %239 : vector<8x1xf32> to vector<8x8xf32>
    %241 = arith.subf %235, %240 : vector<8x8xf32>
    %cst_87 = arith.constant 0.000000e+00 : f32
    %242 = vector.broadcast %cst_87 : f32 to vector<8x8xf32>
    %243 = arith.select %204, %241, %242 : vector<8x8xi1>, vector<8x8xf32>
    %244 = math.exp %243 : vector<8x8xf32>
    %245 = arith.mulf %244, %233 : vector<8x8xf32>
    %246 = arith.mulf %245, %208 : vector<8x8xf32>
    %cst_88 = arith.constant dense<0.000000e+00> : vector<8xf32>
    %247 = vector.multi_reduction <add>, %246, %cst_88 [1] : vector<8x8xf32> to vector<8xf32>
    %248 = vector.shape_cast %247 : vector<8xf32> to vector<8x1xf32>
    %249 = vector.broadcast %248 : vector<8x1xf32> to vector<8x8xf32>
    %250 = arith.divf %246, %249 : vector<8x8xf32>
    %251 = tpu.iota {dimensions = array<i32: 0>} : vector<8x8xi32>
    %252 = tpu.iota {dimensions = array<i32: 1>} : vector<8x8xi32>
    %253 = arith.cmpi eq, %251, %252 : vector<8x8xi32>
    %254 = arith.extui %253 : vector<8x8xi1> to vector<8x8xi32>
    %255 = arith.sitofp %254 : vector<8x8xi32> to vector<8x8xf32>
    %cst_89 = arith.constant dense<0.000000e+00> : vector<8x8xf32>
    %256 = tpu.matmul %255, %250, %cst_89 {dimension_numbers = #tpu.dot_dimension_numbers<[1], [1], [0], [0], [0, 0, 1, 0], [], []>} : vector<8x8xf32>, vector<8x8xf32>, vector<8x8xf32> -> vector<8x8xf32>
    %257 = arith.addf %250, %256 : vector<8x8xf32>
    %cst_90 = arith.constant 6.250000e-02 : f32
    %258 = vector.broadcast %cst_90 : f32 to vector<8x8xf32>
    %259 = arith.mulf %257, %258 : vector<8x8xf32>
    %260 = arith.mulf %88, %88 : vector<8x2xf32>
    %cst_91 = arith.constant dense<0.000000e+00> : vector<8xf32>
    %261 = vector.multi_reduction <add>, %260, %cst_91 [1] : vector<8x2xf32> to vector<8xf32>
    %262 = vector.shape_cast %261 : vector<8xf32> to vector<8x1xf32>
    %cst_92 = arith.constant dense<0.000000e+00> : vector<8x8xf32>
    %263 = tpu.matmul %88, %88, %cst_92 {dimension_numbers = #tpu.dot_dimension_numbers<[1], [1], [0], [0], [0, 0, 1, 0], [], []>} : vector<8x2xf32>, vector<8x2xf32>, vector<8x8xf32> -> vector<8x8xf32>
    %264 = vector.broadcast %262 : vector<8x1xf32> to vector<8x8xf32>
    %265 = arith.subf %264, %263 : vector<8x8xf32>
    %266 = tpu.iota {dimensions = array<i32: 0>} : vector<8x8xi32>
    %267 = tpu.iota {dimensions = array<i32: 1>} : vector<8x8xi32>
    %268 = arith.cmpi eq, %266, %267 : vector<8x8xi32>
    %269 = arith.extui %268 : vector<8x8xi1> to vector<8x8xi32>
    %270 = arith.sitofp %269 : vector<8x8xi32> to vector<8x8xf32>
    %cst_93 = arith.constant dense<0.000000e+00> : vector<8x8xf32>
    %271 = tpu.matmul %270, %265, %cst_93 {dimension_numbers = #tpu.dot_dimension_numbers<[1], [1], [0], [0], [0, 0, 1, 0], [], []>} : vector<8x8xf32>, vector<8x8xf32>, vector<8x8xf32> -> vector<8x8xf32>
    %272 = arith.addf %265, %271 : vector<8x8xf32>
    %cst_94 = arith.constant 1.000000e+00 : f32
    %273 = vector.broadcast %cst_94 : f32 to vector<8x8xf32>
    %274 = arith.addf %272, %273 : vector<8x8xf32>
    %cst_95 = arith.constant 1.000000e+00 : f32
    %275 = vector.broadcast %cst_95 : f32 to vector<8x8xf32>
    %276 = arith.divf %275, %274 : vector<8x8xf32>
    %277 = arith.mulf %276, %208 : vector<8x8xf32>
    %cst_96 = arith.constant dense<0.000000e+00> : vector<8xf32>
    %278 = vector.multi_reduction <add>, %277, %cst_96 [1] : vector<8x8xf32> to vector<8xf32>
    %279 = vector.shape_cast %278 : vector<8xf32> to vector<8x1xf32>
    %c0_i32 = arith.constant 0 : i32
    %280 = vector.broadcast %c0_i32 : i32 to vector<8x128xi32>
    %281 = arith.cmpi eq, %0, %280 : vector<8x128xi32>
    %cst_97 = arith.constant 0.000000e+00 : f32
    %282 = vector.shape_cast %279 : vector<8x1xf32> to vector<8x1xf32>
    %283 = vector.broadcast %282 : vector<8x1xf32> to vector<8x128xf32>
    %284 = vector.broadcast %cst_97 : f32 to vector<8x128xf32>
    %285 = arith.select %281, %283, %284 : vector<8x128xi1>, vector<8x128xf32>
    %c10_i32 = arith.constant 10 : i32
    %286 = vector.broadcast %c10_i32 : i32 to vector<8x128xi32>
    %287 = arith.cmpi eq, %0, %286 : vector<8x128xi32>
    %cst_98 = arith.constant 0.000000e+00 : f32
    %288 = vector.shape_cast %149 : vector<8x1xf32> to vector<8x1xf32>
    %289 = vector.broadcast %288 : vector<8x1xf32> to vector<8x128xf32>
    %290 = vector.broadcast %cst_98 : f32 to vector<8x128xf32>
    %291 = arith.select %287, %289, %290 : vector<8x128xi1>, vector<8x128xf32>
    %292 = arith.addf %285, %291 : vector<8x128xf32>
    %c11_i32 = arith.constant 11 : i32
    %293 = vector.broadcast %c11_i32 : i32 to vector<8x128xi32>
    %294 = arith.cmpi eq, %0, %293 : vector<8x128xi32>
    %cst_99 = arith.constant 0.000000e+00 : f32
    %295 = vector.shape_cast %195 : vector<8x1xf32> to vector<8x1xf32>
    %296 = vector.broadcast %295 : vector<8x1xf32> to vector<8x128xf32>
    %297 = vector.broadcast %cst_99 : f32 to vector<8x128xf32>
    %298 = arith.select %294, %296, %297 : vector<8x128xi1>, vector<8x128xf32>
    %299 = arith.addf %292, %298 : vector<8x128xf32>
    %cst_100 = arith.constant dense<0.000000e+00> : vector<8x128xf32>
    %300 = tpu.matmul %206, %299, %cst_100 {dimension_numbers = #tpu.dot_dimension_numbers<[1], [0], [0], [1], [0, 0, 1, 1], [], []>} : vector<8x8xf32>, vector<8x128xf32>, vector<8x128xf32> -> vector<8x128xf32>
    %301 = vector.extract_strided_slice %300 {offsets = [0, 0], sizes = [8, 1], strides = [1, 1]} : vector<8x128xf32> to vector<8x1xf32>
    %302 = vector.broadcast %301 : vector<8x1xf32> to vector<8x8xf32>
    %303 = arith.mulf %259, %302 : vector<8x8xf32>
    %304 = arith.divf %303, %276 : vector<8x8xf32>
    %cst_101 = arith.constant 0.000000e+00 : f32
    %305 = vector.broadcast %cst_101 : f32 to vector<8x8xf32>
    %306 = arith.cmpf ogt, %259, %305 : vector<8x8xf32>
    %307 = arith.andi %204, %306 : vector<8x8xi1>
    %cst_102 = arith.constant 1.000000e+00 : f32
    %308 = vector.broadcast %cst_102 : f32 to vector<8x8xf32>
    %309 = arith.select %307, %304, %308 : vector<8x8xi1>, vector<8x8xf32>
    %310 = math.log %309 : vector<8x8xf32>
    %311 = arith.mulf %259, %310 : vector<8x8xf32>
    %cst_103 = arith.constant 0.000000e+00 : f32
    %312 = vector.broadcast %cst_103 : f32 to vector<8x8xf32>
    %313 = arith.select %307, %311, %312 : vector<8x8xi1>, vector<8x8xf32>
    %cst_104 = arith.constant dense<0.000000e+00> : vector<8xf32>
    %314 = vector.multi_reduction <add>, %313, %cst_104 [1] : vector<8x8xf32> to vector<8xf32>
    %315 = vector.shape_cast %314 : vector<8xf32> to vector<8x1xf32>
    %c12_i32 = arith.constant 12 : i32
    %316 = vector.broadcast %c12_i32 : i32 to vector<8x128xi32>
    %317 = arith.cmpi eq, %0, %316 : vector<8x128xi32>
    %cst_105 = arith.constant 0.000000e+00 : f32
    %318 = vector.shape_cast %315 : vector<8x1xf32> to vector<8x1xf32>
    %319 = vector.broadcast %318 : vector<8x1xf32> to vector<8x128xf32>
    %320 = vector.broadcast %cst_105 : f32 to vector<8x128xf32>
    %321 = arith.select %317, %319, %320 : vector<8x128xi1>, vector<8x128xf32>
    %cst_106 = arith.constant dense<0.000000e+00> : vector<8x128xf32>
    %322 = tpu.matmul %206, %321, %cst_106 {dimension_numbers = #tpu.dot_dimension_numbers<[1], [0], [0], [1], [0, 0, 1, 1], [], []>} : vector<8x8xf32>, vector<8x128xf32>, vector<8x128xf32> -> vector<8x128xf32>
    %c8_i32_107 = arith.constant 8 : i32
    %323 = vector.broadcast %c8_i32_107 : i32 to vector<8x128xi32>
    %324 = arith.cmpi slt, %0, %323 : vector<8x128xi32>
    %cst_108 = arith.constant 0.000000e+00 : f32
    %325 = vector.broadcast %cst_108 : f32 to vector<8x128xf32>
    %326 = arith.select %324, %26, %325 : vector<8x128xi1>, vector<8x128xf32>
    %c8_i32_109 = arith.constant 8 : i32
    %327 = vector.broadcast %c8_i32_109 : i32 to vector<8x128xi32>
    %328 = arith.cmpi sge, %0, %327 : vector<8x128xi32>
    %c10_i32_110 = arith.constant 10 : i32
    %329 = vector.broadcast %c10_i32_110 : i32 to vector<8x128xi32>
    %330 = arith.cmpi slt, %0, %329 : vector<8x128xi32>
    %331 = arith.andi %328, %330 : vector<8x128xi1>
    %cst_111 = arith.constant 0.000000e+00 : f32
    %332 = vector.broadcast %cst_111 : f32 to vector<8x128xf32>
    %333 = arith.select %331, %87, %332 : vector<8x128xi1>, vector<8x128xf32>
    %334 = arith.addf %326, %333 : vector<8x128xf32>
    %c10_i32_112 = arith.constant 10 : i32
    %335 = vector.broadcast %c10_i32_112 : i32 to vector<8x128xi32>
    %336 = arith.cmpi sge, %0, %335 : vector<8x128xi32>
    %c11_i32_113 = arith.constant 11 : i32
    %337 = vector.broadcast %c11_i32_113 : i32 to vector<8x128xi32>
    %338 = arith.cmpi sle, %0, %337 : vector<8x128xi32>
    %339 = arith.andi %336, %338 : vector<8x128xi1>
    %cst_114 = arith.constant 0.000000e+00 : f32
    %340 = vector.broadcast %cst_114 : f32 to vector<8x128xf32>
    %341 = arith.select %339, %300, %340 : vector<8x128xi1>, vector<8x128xf32>
    %342 = arith.addf %334, %341 : vector<8x128xf32>
    %c12_i32_115 = arith.constant 12 : i32
    %343 = vector.broadcast %c12_i32_115 : i32 to vector<8x128xi32>
    %344 = arith.cmpi eq, %0, %343 : vector<8x128xi32>
    %cst_116 = arith.constant 0.000000e+00 : f32
    %345 = vector.broadcast %cst_116 : f32 to vector<8x128xf32>
    %346 = arith.select %344, %322, %345 : vector<8x128xi1>, vector<8x128xf32>
    %347 = arith.addf %342, %346 : vector<8x128xf32>
    %c0_117 = arith.constant 0 : index
    %c0_118 = arith.constant 0 : index
    %348 = vector.load %arg3[%c0_117, %c0_118] : memref<8x128xf32, #tpu.memory_space<vmem>>, vector<8x128xf32>
    tpu.vector_store %arg3[%c0_117, %c0_118], %347 {strides = array<i32>} : memref<8x128xf32, #tpu.memory_space<vmem>>, vector<8x128xf32>,
    return
  }
  func.func @transform_0(%arg0: i32) -> (i32, i32) {
    %c0_i32 = arith.constant 0 : i32
    %c0_i32_0 = arith.constant 0 : i32
    return %arg0, %c0_i32 : i32, i32
  }
  func.func @transform_1(%arg0: i32) -> (i32, i32, i32) {
    %c0_i32 = arith.constant 0 : i32
    %c0_i32_0 = arith.constant 0 : i32
    %c0_i32_1 = arith.constant 0 : i32
    %c0_i32_2 = arith.constant 0 : i32
    return %c0_i32, %c0_i32_0, %c0_i32_1 : i32, i32, i32
  }
  func.func @transform_2(%arg0: i32) -> (i32, i32) {
    %c0_i32 = arith.constant 0 : i32
    %c0_i32_0 = arith.constant 0 : i32
    return %arg0, %c0_i32 : i32, i32
  }
}

</mosaic_0001>

<bundles_post_ra>
// kernel: mnist_viva_forward.1
= control target key start
LH: loop header
LB: loop body
LE: loop exit
PB: predicated region body
PF: predicated region fallthrough
CT: control target
= control target key end

     0   :  { %7 = vsyncpa [#allocation3], 0  ;;  %s2155_s9 = smov [#allocation2]   ;;  %s2546_s0 = inlined_call_operand.vmem [shape: f32[8,128], index: 0, kind: input, shape index: {}]   ;;  %s2547_s1 = inlined_call_operand.hbm [shape: f32[8,128,128], index: 1, kind: input, shape index: {}]   ;;  %s2548_s2 = inlined_call_operand.vmem [shape: f32[8,128], index: 2, kind: output, shape index: {}]  }
   0x1   :  { %s15_s10 = sshll.u32 %s2155_s9, 4  ;;  %s16_s10 = int_to_ptr.vmem [resolvable:$true] %s15_s10 }
   0x2   :  { %s2141_s11 = scalar_lea.vmem %s16_s10, 16384  ;;  %p2146_p1 = scmp.lt.s32.totalorder %s16_s10, %s16_s10 }
   0x3   :  { %p2142_p0 = scmp.ne.s32.totalorder %s16_s10, %s2141_s11  ;;  %p2147_p2 = scmp.lt.s32.totalorder %s2141_s11, %s2141_s11 }
   0x5   :  { %p2148_p3 = por %p2147_p2, %p2146_p1 }
   0x7   :  { %p2149_p4 = pnand %p2148_p3, %p2142_p0 }
   0x9   :  { %2152 = shalt.err (!%p2149_p4)
}
   0xa   :  { %s2156_s12 = smov 128   ;;  %s2157_s13 = smov 8  }
   0xb   :  { %21 = dma.hbm_to_vmem [thread:$0]  %s2547_s1, 16384, %s16_s10, [#allocation3], %s2156_s12, %s2156_s12, %s2157_s13  }
   0xc   :  { %2153 = dma.done.wait [#allocation3], 16384  }
   0xd   :  { %2154 = vsyncadd [#allocation3], 4294950912  ;;  %v2158_v0 = vmov 0.0   ;;  %vm2159_vm0 = vmmov 0   ;;  %v44_v1 = vld [vmem:[#allocation2 + $0x78] sm:$0xff]  ;;  %v43_v2 = vld [vmem:[#allocation2 + $0x70] sm:$0xff]  ;;  %v25_v37 = vlaneseq }
   0xe   :  { %1756 = vmatprep.subr.mxu0 %v2158_v0  ;;  %1788 = vmatprep.mubr.msk.f32.mxu0 %vm2159_vm0, %v2158_v0  ;;  %v42_v3 = vld [vmem:[#allocation2 + $0x68] sm:$0xff]  ;;  %v41_v4 = vld [vmem:[#allocation2 + $0x60] sm:$0xff]  ;;  %v132_v5 = vld [vmem:[#allocation2 + $0x278] sm:$0xff]  ;;  %s2160_s17 = smov 112   ;;  %vm817_vm11 = vcmask 130048   ;;  %vm829_vm15 = vcmask 15360  }
   0xf   :  { %1791 = vmatprep.subr.mxu1 %v2158_v0  ;;  %1823 = vmatprep.mubr.msk.f32.mxu1 %vm2159_vm0, %v2158_v0  ;;  %v40_v6 = vld [vmem:[#allocation2 + $0x58] sm:$0xff]  ;;  %v131_v7 = vld [vmem:[#allocation2 + $0x270] sm:$0xff]  ;;  %v130_v8 = vld [vmem:[#allocation2 + $0x268] sm:$0xff]  ;;  %v2233_v38 = vand.u32 127, %v25_v37  ;;  %s2162_s18 = smov 110   ;;  %s2163_s19 = smov 108  }
  0x10   :  { %1757 = vmatpush3.msra.mxu0 %v44_v1  ;;  %1792 = vmatpush3.msra.mxu1 %v132_v5  ;;  %v39_v9 = vld [vmem:[#allocation2 + $0x50] sm:$0xff]  ;;  %v129_v10 = vld [vmem:[#allocation2 + $0x260] sm:$0xff]  ;;  %v38_v11 = vld [vmem:[#allocation2 + $0x48] sm:$0xff]  ;;  %s2164_s20 = smov 126  }
  0x11   :  { %1758 = vmatprep.subr.mxu0 %v2158_v0  ;;  %1793 = vmatprep.subr.mxu1 %v2158_v0  ;;  %v128_v12 = vld [vmem:[#allocation2 + $0x258] sm:$0xff]  ;;  %v37_v13 = vld [vmem:[#allocation2 + $0x40] sm:$0xff]  ;;  %v127_v14 = vld [vmem:[#allocation2 + $0x250] sm:$0xff]  ;;  %vm203_vm1 = vcmp.lt.s32.totalorder %v2233_v38, 8  ;;  %v27_v55 = vcvt.s32.f32 %v2233_v38  ;;  %vm225_vm3 = vcmp.ge.s32.totalorder %v2233_v38, 64  ;;  %vm226_vm4 = vcmp.lt.s32.totalorder %v2233_v38, 72 }
  0x12   :  { %1759 = vmatpush3.msra.mxu0 %v43_v2  ;;  %1794 = vmatpush3.msra.mxu1 %v131_v7  ;;  %v36_v15 = vld [vmem:[#allocation2 + $0x38] sm:$0xff]  ;;  %v126_v16 = vld [vmem:[#allocation2 + $0x248] sm:$0xff]  ;;  %v35_v17 = vld [vmem:[#allocation2 + $0x30] sm:$0xff]  ;;  %vm418_vm8 = vcmp.ge.s32.totalorder %v2233_v38, 72  ;;  %vm419_vm9 = vcmp.lt.s32.totalorder %v2233_v38, 88  ;;  %vm607_vm12 = vcmp.ge.s32.totalorder %v2233_v38, 88 }
  0x13   :  { %1760 = vmatprep.subr.mxu0 %v2158_v0  ;;  %1795 = vmatprep.subr.mxu1 %v2158_v0  ;;  %v125_v18 = vld [vmem:[#allocation2 + $0x240] sm:$0xff]  ;;  %v34_v19 = vld [vmem:[#allocation2 + $0x28] sm:$0xff]  ;;  %v124_v20 = vld [vmem:[#allocation2 + $0x238] sm:$0xff]  ;;  %vm608_vm13 = vcmp.lt.s32.totalorder %v2233_v38, 90 }
  0x14   :  { %1761 = vmatpush3.msra.mxu0 %v42_v3  ;;  %1796 = vmatpush3.msra.mxu1 %v130_v8  ;;  %v33_v21 = vld [vmem:[#allocation2 + $0x20] sm:$0xff]  ;;  %v123_v22 = vld [vmem:[#allocation2 + $0x230] sm:$0xff]  ;;  %v32_v23 = vld [vmem:[#allocation2 + $0x18] sm:$0xff] }
  0x15   :  { %1762 = vmatprep.subr.mxu0 %v2158_v0  ;;  %1797 = vmatprep.subr.mxu1 %v2158_v0  ;;  %v122_v24 = vld [vmem:[#allocation2 + $0x228] sm:$0xff]  ;;  %v31_v25 = vld [vmem:[#allocation2 + $0x10] sm:$0xff]  ;;  %v121_v26 = vld [vmem:[#allocation2 + $0x220] sm:$0xff] }
  0x16   :  { %1763 = vmatpush3.msra.mxu0 %v41_v4  ;;  %1798 = vmatpush3.msra.mxu1 %v129_v10  ;;  %v30_v27 = vld [vmem:[#allocation2 + $0x8] sm:$0xff]  ;;  %v120_v28 = vld [vmem:[#allocation2 + $0x218] sm:$0xff]  ;;  %v29_v29 = vld [vmem:[#allocation2] sm:$0xff] }
  0x17   :  { %1764 = vmatprep.subr.mxu0 %v2158_v0  ;;  %1799 = vmatprep.subr.mxu1 %v2158_v0  ;;  %v2218_v30 = vld [vmem:[%s2546_s0] sm:$0xff]  ;;  %v119_v31 = vld [vmem:[#allocation2 + $0x210] sm:$0xff]  ;;  %v118_v32 = vld [vmem:[#allocation2 + $0x208] sm:$0xff] }
  0x18   :  { %1765 = vmatpush3.msra.mxu0 %v40_v6  ;;  %1800 = vmatpush3.msra.mxu1 %v128_v12  ;;  %v117_v33 = vld [vmem:[#allocation2 + $0x200] sm:$0xff]  ;;  %v249_v42 = vld [vmem:[#allocation2 + $0xf8] sm:$0xff]  ;;  %v248_v43 = vld [vmem:[#allocation2 + $0xf0] sm:$0xff]  ;;  %v1580_v12 = vadd.f32 -64.0, %v27_v55 }
  0x19   :  { %1766 = vmatprep.subr.mxu0 %v2158_v0  ;;  %1801 = vmatprep.subr.mxu1 %v2158_v0  ;;  %v247_v44 = vld [vmem:[#allocation2 + $0xe8] sm:$0xff]  ;;  %v246_v45 = vld [vmem:[#allocation2 + $0xe0] sm:$0xff]  ;;  %v245_v46 = vld [vmem:[#allocation2 + $0xd8] sm:$0xff] }
  0x1a   :  { %1767 = vmatpush3.msra.mxu0 %v39_v9  ;;  %1802 = vmatpush3.msra.mxu1 %v127_v14  ;;  %v244_v47 = vld [vmem:[#allocation2 + $0xd0] sm:$0xff]  ;;  %v243_v48 = vld [vmem:[#allocation2 + $0xc8] sm:$0xff]  ;;  %v242_v49 = vld [vmem:[#allocation2 + $0xc0] sm:$0xff] }
  0x1b   :  { %1768 = vmatprep.subr.mxu0 %v2158_v0  ;;  %1803 = vmatprep.subr.mxu1 %v2158_v0  ;;  %v241_v50 = vld [vmem:[#allocation2 + $0xb8] sm:$0xff]  ;;  %v240_v51 = vld [vmem:[#allocation2 + $0xb0] sm:$0xff]  ;;  %v239_v52 = vld [vmem:[#allocation2 + $0xa8] sm:$0xff] }
  0x1c   :  { %1769 = vmatpush3.msra.mxu0 %v38_v11  ;;  %1804 = vmatpush3.msra.mxu1 %v126_v16  ;;  %v238_v53 = vld [vmem:[#allocation2 + $0xa0] sm:$0xff]  ;;  %v237_v54 = vld [vmem:[#allocation2 + $0x98] sm:$0xff]  ;;  %v236_v58 = vld [vmem:[#allocation2 + $0x90] sm:$0xff] }
  0x1d   :  { %1770 = vmatprep.subr.mxu0 %v2158_v0  ;;  %1805 = vmatprep.subr.mxu1 %v2158_v0  ;;  %v235_v59 = vld [vmem:[#allocation2 + $0x88] sm:$0xff]  ;;  %v234_v60 = vld [vmem:[#allocation2 + $0x80] sm:$0xff]  ;;  %v337_v61 = vld [vmem:[#allocation2 + $0x2f8] sm:$0xff] }
  0x1e   :  { %1771 = vmatpush3.msra.mxu0 %v37_v13  ;;  %1806 = vmatpush3.msra.mxu1 %v125_v18  ;;  %v336_v62 = vld [vmem:[#allocation2 + $0x2f0] sm:$0xff]  ;;  %v335_v63 = vld [vmem:[#allocation2 + $0x2e8] sm:$0xff]  ;;  %v334_v1 = vld [vmem:[#allocation2 + $0x2e0] sm:$0xff] }
  0x1f   :  { %1772 = vmatprep.subr.mxu0 %v2158_v0  ;;  %1807 = vmatprep.subr.mxu1 %v2158_v0  ;;  %v333_v2 = vld [vmem:[#allocation2 + $0x2d8] sm:$0xff]  ;;  %v332_v3 = vld [vmem:[#allocation2 + $0x2d0] sm:$0xff]  ;;  %v331_v4 = vld [vmem:[#allocation2 + $0x2c8] sm:$0xff] }
  0x20   :  { %1773 = vmatpush3.msra.mxu0 %v36_v15  ;;  %1808 = vmatpush3.msra.mxu1 %v124_v20  ;;  %v330_v5 = vld [vmem:[#allocation2 + $0x2c0] sm:$0xff]  ;;  %v329_v6 = vld [vmem:[#allocation2 + $0x2b8] sm:$0xff]  ;;  %v328_v7 = vld [vmem:[#allocation2 + $0x2b0] sm:$0xff] }
  0x21   :  { %1774 = vmatprep.subr.mxu0 %v2158_v0  ;;  %1809 = vmatprep.subr.mxu1 %v2158_v0  ;;  %v327_v8 = vld [vmem:[#allocation2 + $0x2a8] sm:$0xff]  ;;  %v326_v9 = vld [vmem:[#allocation2 + $0x2a0] sm:$0xff]  ;;  %v325_v10 = vld [vmem:[#allocation2 + $0x298] sm:$0xff] }
  0x22   :  { %1775 = vmatpush3.msra.mxu0 %v35_v17  ;;  %1810 = vmatpush3.msra.mxu1 %v123_v22  ;;  %v324_v11 = vld [vmem:[#allocation2 + $0x290] sm:$0xff]  ;;  %vm227_vm5 = vmand %vm225_vm3, %vm226_vm4  ;;  %v323_v17 = vld [vmem:[#allocation2 + $0x288] sm:$0xff] }
  0x23   :  { %1776 = vmatprep.subr.mxu0 %v2158_v0  ;;  %1811 = vmatprep.subr.mxu1 %v2158_v0  ;;  %v322_v18 = vld [vmem:[#allocation2 + $0x280] sm:$0xff]  ;;  %v437_v20 = vld [vmem:[#allocation2 + $0x170] sm:$0xff]  ;;  %vm420_vm10 = vmand %vm418_vm8, %vm419_vm9  ;;  %vm1392_vm8 = vcmp.eq.s32.totalorder %v2233_v38, 10  ;;  %vm1395_vm9 = vcmp.eq.s32.totalorder %v2233_v38, 11 }
  0x24   :  { %1777 = vmatpush3.msra.mxu0 %v34_v19  ;;  %1812 = vmatpush3.msra.mxu1 %v122_v24  ;;  %v438_v19 = vld [vmem:[#allocation2 + $0x178] sm:$0xff]  ;;  %v435_v22 = vld [vmem:[#allocation2 + $0x160] sm:$0xff]  ;;  %v433_v24 = vld [vmem:[#allocation2 + $0x150] sm:$0xff] }
  0x25   :  { %1778 = vmatprep.subr.mxu0 %v2158_v0  ;;  %1813 = vmatprep.subr.mxu1 %v2158_v0  ;;  %vm609_vm14 = vmand %vm607_vm12, %vm608_vm13  ;;  %vm1567_vm12 = vcmp.ge.s32.totalorder %v2233_v38, 10  ;;  %vm1568_vm13 = vcmp.le.s32.totalorder %v2233_v38, 11 }
  0x26   :  { %1779 = vmatpush3.msra.mxu0 %v33_v21  ;;  %1814 = vmatpush3.msra.mxu1 %v121_v26  ;;  %v436_v21 = vld [vmem:[#allocation2 + $0x168] sm:$0xff]  ;;  %v431_v26 = vld [vmem:[#allocation2 + $0x140] sm:$0xff] }
  0x27   :  { %1780 = vmatprep.subr.mxu0 %v2158_v0  ;;  %1815 = vmatprep.subr.mxu1 %v2158_v0 }
  0x28   :  { %1781 = vmatpush3.msra.mxu0 %v32_v23  ;;  %1816 = vmatpush3.msra.mxu1 %v120_v28  ;;  %v434_v23 = vld [vmem:[#allocation2 + $0x158] sm:$0xff]  ;;  %v429_v28 = vld [vmem:[#allocation2 + $0x130] sm:$0xff] }
  0x29   :  { %1782 = vmatprep.subr.mxu0 %v2158_v0  ;;  %1817 = vmatprep.subr.mxu1 %v2158_v0 }
  0x2a   :  { %1783 = vmatpush3.msra.mxu0 %v31_v25  ;;  %1818 = vmatpush3.msra.mxu1 %v119_v31  ;;  %v432_v25 = vld [vmem:[#allocation2 + $0x148] sm:$0xff]  ;;  %v426_v31 = vld [vmem:[#allocation2 + $0x118] sm:$0xff] }
  0x2b   :  { %1784 = vmatprep.subr.mxu0 %v2158_v0  ;;  %1819 = vmatprep.subr.mxu1 %v2158_v0 }
  0x2c   :  { %1785 = vmatpush3.msra.mxu0 %v30_v27  ;;  %1820 = vmatpush3.msra.mxu1 %v118_v32  ;;  %v430_v27 = vld [vmem:[#allocation2 + $0x138] sm:$0xff]  ;;  %v425_v32 = vld [vmem:[#allocation2 + $0x110] sm:$0xff] }
  0x2d   :  { %1786 = vmatprep.subr.mxu0 %v2158_v0  ;;  %1821 = vmatprep.subr.mxu1 %v2158_v0 }
  0x2e   :  { %1787 = vmatpush3.msra.mxu0 %v29_v29  ;;  %1822 = vmatpush3.msra.mxu1 %v117_v33  ;;  %v428_v29 = vld [vmem:[#allocation2 + $0x128] sm:$0xff] }
  0x2f   :  { %1789 = vmatmul.mubr.f32.vlgmr.msra.gmra.mxu0 %v2218_v30  ;;  %1826 = vmatprep.subr.mxu0 %v2158_v0  ;;  %v424_v33 = vld [vmem:[#allocation2 + $0x108] sm:$0xff] }
  0x30   :  { %1858 = vmatprep.mubr.msk.f32.mxu0 %vm2159_vm0, %v2158_v0  ;;  %1861 = vmatprep.subr.mxu1 %v2158_v0 }
  0x31   :  { %1827 = vmatpush3.msra.mxu0 %v249_v42  ;;  %v526_v42 = vld [vmem:[#allocation2 + $0x378] sm:$0xff] }
  0x32   :  { %1828 = vmatprep.subr.mxu0 %v2158_v0 }
  0x33   :  { %1829 = vmatpush3.msra.mxu0 %v248_v43  ;;  %v525_v43 = vld [vmem:[#allocation2 + $0x370] sm:$0xff] }
  0x34   :  { %1830 = vmatprep.subr.mxu0 %v2158_v0 }
  0x35   :  { %1831 = vmatpush3.msra.mxu0 %v247_v44  ;;  %v524_v44 = vld [vmem:[#allocation2 + $0x368] sm:$0xff] }
  0x36   :  { %1832 = vmatprep.subr.mxu0 %v2158_v0 }
  0x37   :  { %1833 = vmatpush3.msra.mxu0 %v246_v45  ;;  %v523_v45 = vld [vmem:[#allocation2 + $0x360] sm:$0xff] }
  0x38   :  { %1834 = vmatprep.subr.mxu0 %v2158_v0 }
  0x39   :  { %1835 = vmatpush3.msra.mxu0 %v245_v46 }
  0x3a   :  { %1836 = vmatprep.subr.mxu0 %v2158_v0 }
  0x3b   :  { %1837 = vmatpush3.msra.mxu0 %v244_v47 }
  0x3c   :  { %1838 = vmatprep.subr.mxu0 %v2158_v0 }
  0x3d   :  { %1839 = vmatpush3.msra.mxu0 %v243_v48 }
  0x3e   :  { %1840 = vmatprep.subr.mxu0 %v2158_v0 }
  0x3f   :  { %1841 = vmatpush3.msra.mxu0 %v242_v49 }
  0x40   :  { %1842 = vmatprep.subr.mxu0 %v2158_v0 }
  0x41   :  { %1843 = vmatpush3.msra.mxu0 %v241_v50 }
  0x42   :  { %1844 = vmatprep.subr.mxu0 %v2158_v0 }
  0x43   :  { %1845 = vmatpush3.msra.mxu0 %v240_v51 }
  0x44   :  { %1846 = vmatprep.subr.mxu0 %v2158_v0 }
  0x45   :  { %1847 = vmatpush3.msra.mxu0 %v239_v52 }
  0x46   :  { %1848 = vmatprep.subr.mxu0 %v2158_v0 }
  0x47   :  { %1849 = vmatpush3.msra.mxu0 %v238_v53 }
  0x48   :  { %1850 = vmatprep.subr.mxu0 %v2158_v0 }
  0x49   :  { %1851 = vmatpush3.msra.mxu0 %v237_v54 }
  0x4a   :  { %1852 = vmatprep.subr.mxu0 %v2158_v0 }
  0x4b   :  { %1853 = vmatpush3.msra.mxu0 %v236_v58 }
  0x4c   :  { %1854 = vmatprep.subr.mxu0 %v2158_v0 }
  0x4d   :  { %1855 = vmatpush3.msra.mxu0 %v235_v59 }
  0x4e   :  { %1856 = vmatprep.subr.mxu0 %v2158_v0 }
  0x4f   :  { %1857 = vmatpush3.msra.mxu0 %v234_v60 }
  0x50   :  { %1896 = vmatprep.subr.mxu0 %v2158_v0 }
  0xef   :  { %v111_v34 = vpop.f32.mrf.mxu0 }
  0xf0   :  { %v115_v35 = vmax.f32 %v111_v34, 0.0 }
  0xf1   :  { %v1790_v36 = vpop.f32.mrf.mxu0 }
  0xf2   :  { %1824 = vmatmul.mubr.f32.vlgmr.msra.gmra.mxu1 %v115_v35 }
  0xf3   :  { %1893 = vmatprep.mubr.msk.f32.mxu1 %vm2159_vm0, %v2158_v0  ;;  %1862 = vmatpush3.msra.mxu1 %v337_v61  ;;  %v522_v61 = vld [vmem:[#allocation2 + $0x358] sm:$0xff] }
  0xf4   :  { %1863 = vmatprep.subr.mxu1 %v2158_v0 }
  0xf5   :  { %1864 = vmatpush3.msra.mxu1 %v336_v62  ;;  %v521_v62 = vld [vmem:[#allocation2 + $0x350] sm:$0xff] }
  0xf6   :  { %1865 = vmatprep.subr.mxu1 %v2158_v0 }
  0xf7   :  { %1866 = vmatpush3.msra.mxu1 %v335_v63  ;;  %v520_v63 = vld [vmem:[#allocation2 + $0x348] sm:$0xff] }
  0xf8   :  { %1867 = vmatprep.subr.mxu1 %v2158_v0 }
  0xf9   :  { %1868 = vmatpush3.msra.mxu1 %v334_v1  ;;  %v519_v1 = vld [vmem:[#allocation2 + $0x340] sm:$0xff] }
  0xfa   :  { %1869 = vmatprep.subr.mxu1 %v2158_v0 }
  0xfb   :  { %1870 = vmatpush3.msra.mxu1 %v333_v2  ;;  %v518_v2 = vld [vmem:[#allocation2 + $0x338] sm:$0xff] }
  0xfc   :  { %1871 = vmatprep.subr.mxu1 %v2158_v0 }
  0xfd   :  { %1872 = vmatpush3.msra.mxu1 %v332_v3  ;;  %v517_v3 = vld [vmem:[#allocation2 + $0x330] sm:$0xff] }
  0xfe   :  { %1873 = vmatprep.subr.mxu1 %v2158_v0 }
  0xff   :  { %1874 = vmatpush3.msra.mxu1 %v331_v4  ;;  %v516_v4 = vld [vmem:[#allocation2 + $0x328] sm:$0xff] }
 0x100   :  { %1875 = vmatprep.subr.mxu1 %v2158_v0 }
 0x101   :  { %1876 = vmatpush3.msra.mxu1 %v330_v5  ;;  %v515_v5 = vld [vmem:[#allocation2 + $0x320] sm:$0xff] }
 0x102   :  { %1877 = vmatprep.subr.mxu1 %v2158_v0 }
 0x103   :  { %1878 = vmatpush3.msra.mxu1 %v329_v6 }
 0x104   :  { %1879 = vmatprep.subr.mxu1 %v2158_v0 }
 0x105   :  { %1880 = vmatpush3.msra.mxu1 %v328_v7  ;;  %v514_v7 = vld [vmem:[#allocation2 + $0x318] sm:$0xff] }
 0x106   :  { %1881 = vmatprep.subr.mxu1 %v2158_v0 }
 0x107   :  { %1882 = vmatpush3.msra.mxu1 %v327_v8  ;;  %v513_v8 = vld [vmem:[#allocation2 + $0x310] sm:$0xff] }
 0x108   :  { %1883 = vmatprep.subr.mxu1 %v2158_v0 }
 0x109   :  { %1884 = vmatpush3.msra.mxu1 %v326_v9  ;;  %v512_v9 = vld [vmem:[#allocation2 + $0x308] sm:$0xff] }
 0x10a   :  { %1885 = vmatprep.subr.mxu1 %v2158_v0 }
 0x10b   :  { %1886 = vmatpush3.msra.mxu1 %v325_v10  ;;  %v511_v10 = vld [vmem:[#allocation2 + $0x300] sm:$0xff] }
 0x10c   :  { %1887 = vmatprep.subr.mxu1 %v2158_v0 }
 0x10d   :  { %1888 = vmatpush3.msra.mxu1 %v324_v11 }
 0x10e   :  { %1889 = vmatprep.subr.mxu1 %v2158_v0 }
 0x10f   :  { %1890 = vmatpush3.msra.mxu1 %v323_v17  ;;  %v626_v17 = vld [vmem:[#allocation2 + $0x1f0] sm:$0xff] }
 0x110   :  { %1891 = vmatprep.subr.mxu1 %v2158_v0 }
 0x111   :  { %1892 = vmatpush3.msra.mxu1 %v322_v18  ;;  %v625_v18 = vld [vmem:[#allocation2 + $0x1e8] sm:$0xff] }
 0x112   :  { %1931 = vmatprep.subr.mxu1 %v2158_v0 }
 0x1b2   :  { %v2236_v39 = vpop.f32.mrf.mxu1 }
 0x1b3   :  { %v2241_v40 = vsel %vm203_vm1, %v2236_v39, -inf }
 0x1b4   :  { %205 = vmax.xlane.f32.xlu0 %v2241_v40  ;;  %v1825_v41 = vpop.f32.mrf.mxu1 }
 0x1b5   :  { %v423_v41 = vld [vmem:[#allocation2 + $0x100] sm:$0xff] }
 0x23d   :  { %v2258_v56 = vpop.xlane.xlu0 %205 }
 0x23e   :  { %vm221_vm2 = vcmp.eq.f32.partialorder %v2241_v40, %v2258_v56 }
 0x23f   :  { %v222_v57 = vsel %vm221_vm2, %v27_v55, 128.0 }
 0x240   :  { %223 = vmin.xlane.f32.xlu0 %v222_v57 }
 0x2c9   :  { %v224_v13 = vpop.xlane.xlu0 %223 }
 0x2ca   :  { %vm229_vm6 = vcmp.eq.f32.partialorder %v1580_v12, %v224_v13 }
 0x2cb   :  { %vm2281_vm7 = vmand %vm227_vm5, %vm229_vm6  ;;  %vm1135_vm5 = vcmask 64512  }
 0x2cc   :  { %v231_v15 = vsel %vm2281_vm7, 1.0, %v2158_v0 }
 0x2cd   :  { %v2289_v16 = vadd.f32 %v231_v15, %v2218_v30  ;;  %v427_v30 = vld [vmem:[#allocation2 + $0x120] sm:$0xff] }
 0x2cf   :  { %1859 = vmatmul.mubr.f32.vlgmr.msra.gmra.mxu0 %v2289_v16 }
 0x2d0   :  { %1928 = vmatprep.mubr.msk.f32.mxu0 %vm2159_vm0, %v2158_v0  ;;  %1897 = vmatpush3.msra.mxu0 %v438_v19  ;;  %v624_v19 = vld [vmem:[#allocation2 + $0x1e0] sm:$0xff] }
 0x2d1   :  { %1898 = vmatprep.subr.mxu0 %v2158_v0 }
 0x2d2   :  { %1899 = vmatpush3.msra.mxu0 %v437_v20 }
 0x2d3   :  { %1900 = vmatprep.subr.mxu0 %v2158_v0 }
 0x2d4   :  { %1901 = vmatpush3.msra.mxu0 %v436_v21  ;;  %v623_v21 = vld [vmem:[#allocation2 + $0x1d8] sm:$0xff] }
 0x2d5   :  { %1902 = vmatprep.subr.mxu0 %v2158_v0 }
 0x2d6   :  { %1903 = vmatpush3.msra.mxu0 %v435_v22 }
 0x2d7   :  { %1904 = vmatprep.subr.mxu0 %v2158_v0 }
 0x2d8   :  { %1905 = vmatpush3.msra.mxu0 %v434_v23 }
 0x2d9   :  { %1906 = vmatprep.subr.mxu0 %v2158_v0 }
 0x2da   :  { %1907 = vmatpush3.msra.mxu0 %v433_v24  ;;  %v622_v24 = vld [vmem:[#allocation2 + $0x1d0] sm:$0xff] }
 0x2db   :  { %1908 = vmatprep.subr.mxu0 %v2158_v0 }
 0x2dc   :  { %1909 = vmatpush3.msra.mxu0 %v432_v25  ;;  %v621_v25 = vld [vmem:[#allocation2 + $0x1c8] sm:$0xff] }
 0x2dd   :  { %1910 = vmatprep.subr.mxu0 %v2158_v0 }
 0x2de   :  { %1911 = vmatpush3.msra.mxu0 %v431_v26  ;;  %v620_v26 = vld [vmem:[#allocation2 + $0x1c0] sm:$0xff] }
 0x2df   :  { %1912 = vmatprep.subr.mxu0 %v2158_v0 }
 0x2e0   :  { %1913 = vmatpush3.msra.mxu0 %v430_v27  ;;  %v619_v27 = vld [vmem:[#allocation2 + $0x1b8] sm:$0xff] }
 0x2e1   :  { %1914 = vmatprep.subr.mxu0 %v2158_v0 }
 0x2e2   :  { %1915 = vmatpush3.msra.mxu0 %v429_v28  ;;  %v618_v28 = vld [vmem:[#allocation2 + $0x1b0] sm:$0xff] }
 0x2e3   :  { %1916 = vmatprep.subr.mxu0 %v2158_v0 }
 0x2e4   :  { %1917 = vmatpush3.msra.mxu0 %v428_v29  ;;  %v617_v29 = vld [vmem:[#allocation2 + $0x1a8] sm:$0xff] }
 0x2e5   :  { %1918 = vmatprep.subr.mxu0 %v2158_v0 }
 0x2e6   :  { %1919 = vmatpush3.msra.mxu0 %v427_v30  ;;  %v616_v30 = vld [vmem:[#allocation2 + $0x1a0] sm:$0xff] }
 0x2e7   :  { %1920 = vmatprep.subr.mxu0 %v2158_v0 }
 0x2e8   :  { %1921 = vmatpush3.msra.mxu0 %v426_v31  ;;  %v615_v31 = vld [vmem:[#allocation2 + $0x198] sm:$0xff] }
 0x2e9   :  { %1922 = vmatprep.subr.mxu0 %v2158_v0 }
 0x2ea   :  { %1923 = vmatpush3.msra.mxu0 %v425_v32  ;;  %v614_v32 = vld [vmem:[#allocation2 + $0x190] sm:$0xff] }
 0x2eb   :  { %1924 = vmatprep.subr.mxu0 %v2158_v0 }
 0x2ec   :  { %1925 = vmatpush3.msra.mxu0 %v424_v33  ;;  %v613_v33 = vld [vmem:[#allocation2 + $0x188] sm:$0xff] }
 0x2ed   :  { %1926 = vmatprep.subr.mxu0 %v2158_v0 }
 0x2ee   :  { %1927 = vmatpush3.msra.mxu0 %v423_v41  ;;  %v722_v41 = vld [vmem:[#allocation2 + $0x3e8] sm:$0xff] }
 0x2ef   :  { %1966 = vmatprep.subr.mxu0 %v2158_v0 }
 0x38f   :  { %v316_v34 = vpop.f32.mrf.mxu0 }
 0x390   :  { %v320_v35 = vmax.f32 %v316_v34, 0.0  ;;  %v612_v34 = vld [vmem:[#allocation2 + $0x180] sm:$0xff] }
 0x391   :  { %v1860_v36 = vpop.f32.mrf.mxu0 }
 0x392   :  { %1894 = vmatmul.mubr.f32.vlgmr.msra.gmra.mxu1 %v320_v35  ;;  %v724_v35 = vld [vmem:[#allocation2 + $0x3f8] sm:$0xff]  ;;  %v723_v36 = vld [vmem:[#allocation2 + $0x3f0] sm:$0xff] }
 0x393   :  { %1963 = vmatprep.mubr.msk.f32.mxu1 %vm2159_vm0, %v2158_v0  ;;  %1932 = vmatpush3.msra.mxu1 %v526_v42  ;;  %v721_v42 = vld [vmem:[#allocation2 + $0x3e0] sm:$0xff] }
 0x394   :  { %1933 = vmatprep.subr.mxu1 %v2158_v0 }
 0x395   :  { %1934 = vmatpush3.msra.mxu1 %v525_v43  ;;  %v720_v43 = vld [vmem:[#allocation2 + $0x3d8] sm:$0xff] }
 0x396   :  { %1935 = vmatprep.subr.mxu1 %v2158_v0 }
 0x397   :  { %1936 = vmatpush3.msra.mxu1 %v524_v44  ;;  %v719_v44 = vld [vmem:[#allocation2 + $0x3d0] sm:$0xff] }
 0x398   :  { %1937 = vmatprep.subr.mxu1 %v2158_v0 }
 0x399   :  { %1938 = vmatpush3.msra.mxu1 %v523_v45  ;;  %v718_v45 = vld [vmem:[#allocation2 + $0x3c8] sm:$0xff] }
 0x39a   :  { %1939 = vmatprep.subr.mxu1 %v2158_v0 }
 0x39b   :  { %1940 = vmatpush3.msra.mxu1 %v522_v61  ;;  %v2161_v61 = vmov 1.0  }
 0x39c   :  { %1941 = vmatprep.subr.mxu1 %v2158_v0 }
 0x39d   :  { %1942 = vmatpush3.msra.mxu1 %v521_v62 }
 0x39e   :  { %1943 = vmatprep.subr.mxu1 %v2158_v0 }
 0x39f   :  { %1944 = vmatpush3.msra.mxu1 %v520_v63 }
 0x3a0   :  { %1945 = vmatprep.subr.mxu1 %v2158_v0 }
 0x3a1   :  { %1946 = vmatpush3.msra.mxu1 %v519_v1 }
 0x3a2   :  { %1947 = vmatprep.subr.mxu1 %v2158_v0 }
 0x3a3   :  { %1948 = vmatpush3.msra.mxu1 %v518_v2 }
 0x3a4   :  { %1949 = vmatprep.subr.mxu1 %v2158_v0 }
 0x3a5   :  { %1950 = vmatpush3.msra.mxu1 %v517_v3 }
 0x3a6   :  { %1951 = vmatprep.subr.mxu1 %v2158_v0 }
 0x3a7   :  { %1952 = vmatpush3.msra.mxu1 %v516_v4 }
 0x3a8   :  { %1953 = vmatprep.subr.mxu1 %v2158_v0 }
 0x3a9   :  { %1954 = vmatpush3.msra.mxu1 %v515_v5 }
 0x3aa   :  { %1955 = vmatprep.subr.mxu1 %v2158_v0 }
 0x3ab   :  { %1956 = vmatpush3.msra.mxu1 %v514_v7 }
 0x3ac   :  { %1957 = vmatprep.subr.mxu1 %v2158_v0 }
 0x3ad   :  { %1958 = vmatpush3.msra.mxu1 %v513_v8 }
 0x3ae   :  { %1959 = vmatprep.subr.mxu1 %v2158_v0 }
 0x3af   :  { %1960 = vmatpush3.msra.mxu1 %v512_v9 }
 0x3b0   :  { %1961 = vmatprep.subr.mxu1 %v2158_v0 }
 0x3b1   :  { %1962 = vmatpush3.msra.mxu1 %v511_v10 }
 0x3b2   :  { %2001 = vmatprep.subr.mxu1 %v2158_v0 }
 0x452   :  { %v2320_v46 = vpop.f32.mrf.mxu1 }
 0x453   :  { %v409_v47 = vand.u32 2147483647, %v2320_v46  ;;  %v2325_v48 = vsel %vm420_vm10, %v2320_v46, %v2289_v16  ;;  %v408_v55 = vmax.f32 %v2320_v46, 0.0  ;;  %v627_v16 = vld [vmem:[#allocation2 + $0x1f8] sm:$0xff]  ;;  %v982_v2 = vmul.f32 %v2320_v46, %v2320_v46 }
 0x454   :  { %v1895_v49 = vpop.f32.mrf.mxu1  ;;  %1929 = vmatmul.mubr.f32.vlgmr.msra.gmra.mxu0 %v2325_v48  ;;  %vm1562_vm10 = vcmp.ge.s32.totalorder %v2233_v38, 8 }
 0x455   :  { %v410_v50 = vsub.f32 0.0, %v409_v47  ;;  %1998 = vmatprep.mubr.msk.f32.mxu0 %vm2159_vm0, %v2158_v0  ;;  %1967 = vmatpush3.msra.mxu0 %v627_v16  ;;  %v717_v47 = vld [vmem:[#allocation2 + $0x3c0] sm:$0xff]  ;;  %v716_v49 = vld [vmem:[#allocation2 + $0x3b8] sm:$0xff] }
 0x456   :  { %1968 = vmatprep.subr.mxu0 %v2158_v0 }
 0x457   :  { %v411_v51 = vmul.f32 1.442695, %v410_v50  ;;  %1969 = vmatpush3.msra.mxu0 %v626_v17  ;;  %v715_v50 = vld [vmem:[#allocation2 + $0x3b0] sm:$0xff] }
 0x458   :  { %1970 = vmatprep.subr.mxu0 %v2158_v0 }
 0x459   :  { %2088 = vpow2.f32 %v411_v51  ;;  %1971 = vmatpush3.msra.mxu0 %v625_v18  ;;  %v714_v51 = vld [vmem:[#allocation2 + $0x3a8] sm:$0xff] }
 0x45a   :  { %1972 = vmatprep.subr.mxu0 %v2158_v0 }
 0x45b   :  { %1973 = vmatpush3.msra.mxu0 %v624_v19 }
 0x45c   :  { %1974 = vmatprep.subr.mxu0 %v2158_v0 }
 0x45d   :  { %1975 = vmatpush3.msra.mxu0 %v623_v21  ;;  %v2440_v21 = vshrl.u32 %v25_v37, 7 }
 0x45e   :  { %1976 = vmatprep.subr.mxu0 %v2158_v0 }
 0x45f   :  { %1977 = vmatpush3.msra.mxu0 %v622_v24  ;;  %v884_v24 = vshra.s32 %v2233_v38, 3  ;;  %vm886_vm3 = vcmp.ne.s32.totalorder %v2440_v21, %v2233_v38  ;;  %vm1150_vm6 = vcmp.eq.s32.totalorder %v2440_v21, %v2233_v38 }
 0x460   :  { %1978 = vmatprep.subr.mxu0 %v2158_v0 }
 0x461   :  { %1979 = vmatpush3.msra.mxu0 %v621_v25 }
 0x462   :  { %1980 = vmatprep.subr.mxu0 %v2158_v0 }
 0x463   :  { %1981 = vmatpush3.msra.mxu0 %v620_v26 }
 0x464   :  { %1982 = vmatprep.subr.mxu0 %v2158_v0 }
 0x465   :  { %1983 = vmatpush3.msra.mxu0 %v619_v27 }
 0x466   :  { %v2089_v52 = vpop.eup %2088  ;;  %1984 = vmatprep.subr.mxu0 %v2158_v0 }
 0x467   :  { %v413_v53 = vadd.f32 1.0, %v2089_v52  ;;  %1985 = vmatpush3.msra.mxu0 %v618_v28  ;;  %v713_v52 = vld [vmem:[#allocation2 + $0x3a0] sm:$0xff] }
 0x468   :  { %1986 = vmatprep.subr.mxu0 %v2158_v0 }
 0x469   :  { %2090 = vlog2.f32 %v413_v53  ;;  %1987 = vmatpush3.msra.mxu0 %v617_v29  ;;  %v712_v53 = vld [vmem:[#allocation2 + $0x398] sm:$0xff] }
 0x46a   :  { %1988 = vmatprep.subr.mxu0 %v2158_v0 }
 0x46b   :  { %1989 = vmatpush3.msra.mxu0 %v616_v30 }
 0x46c   :  { %1990 = vmatprep.subr.mxu0 %v2158_v0 }
 0x46d   :  { %1991 = vmatpush3.msra.mxu0 %v615_v31 }
 0x46e   :  { %1992 = vmatprep.subr.mxu0 %v2158_v0 }
 0x46f   :  { %1993 = vmatpush3.msra.mxu0 %v614_v32 }
 0x470   :  { %1994 = vmatprep.subr.mxu0 %v2158_v0 }
 0x471   :  { %1995 = vmatpush3.msra.mxu0 %v613_v33 }
 0x472   :  { %1996 = vmatprep.subr.mxu0 %v2158_v0 }
 0x473   :  { %1997 = vmatpush3.msra.mxu0 %v612_v34 }
 0x474   :  { %2036 = vmatprep.subr.mxu0 %v2158_v0 }
 0x476   :  { %v2091_v54 = vpop.eup %2090 }
 0x477   :  { %v415_v57 = vmul.f32 0.6931472, %v2091_v54  ;;  %v711_v54 = vld [vmem:[#allocation2 + $0x390] sm:$0xff] }
 0x479   :  { %v416_v58 = vadd.f32 %v415_v57, %v408_v55  ;;  %v710_v55 = vld [vmem:[#allocation2 + $0x388] sm:$0xff] }
 0x47b   :  { %v2331_v59 = vadd.f32 1e-05, %v416_v58 }
 0x47d   :  { %v892_v60 = vmul.f32 100.0, %v2331_v59 }
 0x47f   :  { %2092 = vrcp.f32 %v892_v60 }
 0x48c   :  { %v2093_v6 = vpop.eup %2092 }
 0x48d   :  { %896 = vrot.lane.b32.xlu1 %v2093_v6, %s2160_s17 }
 0x4ff   :  { %v2347_v11 = vpop.permute.xlu1 %896 }
 0x500   :  { %v2351_v12 = vmul.f32 %v2347_v11, %v2320_v46 }
 0x502   :  { %v900_v13 = vmul.f32 %v2351_v12, %v2320_v46 }
 0x504   :  { %v901_v15 = vsel %vm817_vm11, %v900_v13, 0.0 }
 0x505   :  { %902 = vadd.xlane.f32.xlu1 %v901_v15 }
 0x514   :  { %v505_v20 = vpop.f32.mrf.mxu0 }
 0x515   :  { %v509_v22 = vmax.f32 %v505_v20, 0.0 }
 0x516   :  { %v1930_v23 = vpop.f32.mrf.mxu0 }
 0x517   :  { %1964 = vmatmul.mubr.f32.vlgmr.msra.gmra.mxu1 %v509_v22  ;;  %v883_v23 = vshra.s32 %v2440_v21, 3 }
 0x518   :  { %2033 = vmatprep.mubr.msk.f32.mxu1 %vm2159_vm0, %v2158_v0  ;;  %2002 = vmatpush3.msra.mxu1 %v724_v35 }
 0x519   :  { %2003 = vmatprep.subr.mxu1 %v2158_v0  ;;  %vm2446_vm2 = vcmp.eq.s32.totalorder %v883_v23, %v884_v24 }
 0x51a   :  { %2004 = vmatpush3.msra.mxu1 %v723_v36  ;;  %vm2454_vm4 = vmand %vm2446_vm2, %vm886_vm3  ;;  %vm1489_vm3 = vcmp.eq.s32.totalorder %v2233_v38, 12 }
 0x51b   :  { %2005 = vmatprep.subr.mxu1 %v2158_v0 }
 0x51c   :  { %2006 = vmatpush3.msra.mxu1 %v722_v41 }
 0x51d   :  { %2007 = vmatprep.subr.mxu1 %v2158_v0 }
 0x51e   :  { %2008 = vmatpush3.msra.mxu1 %v721_v42 }
 0x51f   :  { %2009 = vmatprep.subr.mxu1 %v2158_v0 }
 0x520   :  { %2010 = vmatpush3.msra.mxu1 %v720_v43 }
 0x521   :  { %2011 = vmatprep.subr.mxu1 %v2158_v0 }
 0x522   :  { %2012 = vmatpush3.msra.mxu1 %v719_v44 }
 0x523   :  { %2013 = vmatprep.subr.mxu1 %v2158_v0 }
 0x524   :  { %2014 = vmatpush3.msra.mxu1 %v718_v45 }
 0x525   :  { %2015 = vmatprep.subr.mxu1 %v2158_v0 }
 0x526   :  { %2016 = vmatpush3.msra.mxu1 %v717_v47 }
 0x527   :  { %2017 = vmatprep.subr.mxu1 %v2158_v0 }
 0x528   :  { %2018 = vmatpush3.msra.mxu1 %v716_v49 }
 0x529   :  { %2019 = vmatprep.subr.mxu1 %v2158_v0 }
 0x52a   :  { %2020 = vmatpush3.msra.mxu1 %v715_v50 }
 0x52b   :  { %2021 = vmatprep.subr.mxu1 %v2158_v0 }
 0x52c   :  { %2022 = vmatpush3.msra.mxu1 %v714_v51  ;;  %v207_v51 = vsub.f32 %v2241_v40, %v2258_v56 }
 0x52d   :  { %2023 = vmatprep.subr.mxu1 %v2158_v0 }
 0x52e   :  { %2024 = vmatpush3.msra.mxu1 %v713_v52 }
 0x52f   :  { %2025 = vmatprep.subr.mxu1 %v2158_v0 }
 0x530   :  { %2026 = vmatpush3.msra.mxu1 %v712_v53  ;;  %v208_v53 = vmul.f32 1.442695, %v207_v51 }
 0x531   :  { %2027 = vmatprep.subr.mxu1 %v2158_v0 }
 0x532   :  { %2028 = vmatpush3.msra.mxu1 %v711_v54 }
 0x533   :  { %2029 = vmatprep.subr.mxu1 %v2158_v0 }
 0x534   :  { %2030 = vmatpush3.msra.mxu1 %v710_v55 }
 0x535   :  { %2031 = vmatprep.subr.mxu1 %v2158_v0 }
 0x58e   :  { %v903_v26 = vpop.xlane.xlu1 %902 }
 0x5d7   :  { %v2391_v57 = vpop.f32.mrf.mxu1 }
 0x5d8   :  { %v610_v58 = vsel %vm609_vm14, %v2391_v57, %v2325_v48  ;;  %v709_v48 = vld [vmem:[#allocation2 + $0x380] sm:$0xff]  ;;  %v598_v36 = vand.u32 2147483647, %v2391_v57  ;;  %v1231_v40 = vmul.f32 %v2391_v57, %v2391_v57 }
 0x5d9   :  { %v1965_v60 = vpop.f32.mrf.mxu1  ;;  %1999 = vmatmul.mubr.f32.vlgmr.msra.gmra.mxu0 %v610_v58  ;;  %2032 = vmatpush3.msra.mxu1 %v709_v48 }
 0x5da   :  { %2037 = vmatpush3.xpose.msk.msra.mxu0 %vm817_vm11, %v2320_v46  ;;  %2038 = vmatprep.mubr.msk.f32.mxu0 %vm2159_vm0, %v2158_v0  ;;  %v599_v41 = vsub.f32 0.0, %v598_v36  ;;  %v2469_v60 = vsel %vm2454_vm4, 1.0, %v2158_v0 }
 0x5db   :  { %2046 = vmatprep.subr.mxu0 %v2158_v0  ;;  %2041 = vmatprep.subr.mxu1 %v2158_v0 }
 0x5dc   :  { %v600_v44 = vmul.f32 1.442695, %v599_v41 }
 0x5dd   :  { %2039 = vmatmul.mubr.msk.f32.vlgmr.msra.gmra.mxu0 %vm817_vm11, %v2351_v12 }
 0x5de   :  { %2047 = vmatpush3.xpose.msk.msra.mxu0 %vm2281_vm7, %v2161_v61  ;;  %2048 = vmatprep.mubr.msk.f32.mxu0 %vm2159_vm0, %v2158_v0 }
 0x5df   :  { %2056 = vmatprep.subr.mxu0 %v2158_v0 }
 0x5e1   :  { %2049 = vmatmul.mubr.msk.f32.vlgmr.msra.gmra.mxu0 %vm2281_vm7, %v2161_v61  ;;  %vm1390_vm7 = vcmp.eq.s32.totalorder %v2233_v38, 0 }
 0x5e2   :  { %2057 = vmatpush3.xpose.msk.msra.mxu0 %vm829_vm15, %v2391_v57  ;;  %2058 = vmatprep.mubr.msk.f32.mxu0 %vm2159_vm0, %v2158_v0 }
 0x5e3   :  { %2066 = vmatprep.subr.mxu0 %v2158_v0 }
 0x5e5   :  { %2059 = vmatmul.mubr.msk.f32.vlgmr.msra.gmra.mxu0 %vm829_vm15, %v2391_v57 }
 0x5e6   :  { %2068 = vmatprep.mubr.msk.f32.mxu0 %vm2159_vm0, %v2158_v0 }
 0x699   :  { %v2419_v14 = vpop.f32.mrf.mxu0 }
 0x69a   :  { %v698_v62 = vmax.f32 %v2419_v14, 0.0  ;;  %v699_v63 = vand.u32 2147483647, %v2419_v14  ;;  %v863_v21 = vsub.f32 %v2391_v57, %v2419_v14 }
 0x69b   :  { %v2000_v1 = vpop.f32.mrf.mxu0 }
 0x69c   :  { %v700_v3 = vsub.f32 0.0, %v699_v63  ;;  %2034 = vmatmul.mubr.f32.vlgmr.msra.gmra.mxu1 %v698_v62  ;;  %v1232_v1 = vsel %vm829_vm15, %v1231_v40, 0.0 }
 0x69d   :  { %2042 = vmatpush3.xpose.msk.msra.mxu1 %vm817_vm11, %v982_v2  ;;  %v976_v4 = vpop.f32.mrf.mxu0  ;;  %2043 = vmatprep.mubr.msk.f32.mxu1 %vm2159_vm0, %v2158_v0 }
 0x69e   :  { %v701_v5 = vmul.f32 1.442695, %v700_v3  ;;  %2051 = vmatprep.subr.mxu1 %v2158_v0  ;;  %v980_v22 = vmul.f32 2.0, %v976_v4 }
 0x69f   :  { %v2040_v6 = vpop.f32.mrf.mxu0 }
 0x6a0   :  { %2094 = vpow2.f32 %v701_v5  ;;  %2044 = vmatmul.mubr.msk.f32.vlgmr.msra.gmra.mxu1 %vm817_vm11, %v2347_v11  ;;  %v981_v28 = vsub.f32 %v903_v26, %v980_v22  ;;  %v597_v5 = vmax.f32 %v2391_v57, 0.0 }
 0x6a1   :  { %v1125_v7 = vpop.f32.mrf.mxu0  ;;  %2053 = vmatprep.mubr.msk.f32.mxu1 %vm2159_vm0, %v2158_v0 }
 0x6a2   :  { %v1129_v49 = vmul.f32 2.0, %v1125_v7 }
 0x6a3   :  { %v2050_v8 = vpop.f32.mrf.mxu0 }
 0x6a4   :  { %v1593_v50 = vadd.f32 -1.0, %v1129_v49 }
 0x6a5   :  { %v2433_v9 = vpop.f32.mrf.mxu0 }
 0x6a6   :  { %v1131_v52 = vmul.f32 0.5, %v1593_v50 }
 0x6a7   :  { %v2060_v10 = vpop.f32.mrf.mxu0 }
 0x6a8   :  { %v1132_v55 = vadd.f32 1.0, %v1131_v52 }
 0x6ad   :  { %v2095_v12 = vpop.eup %2094 }
 0x6ae   :  { %v703_v13 = vadd.f32 1.0, %v2095_v12 }
 0x6b0   :  { %2096 = vlog2.f32 %v703_v13 }
 0x6bd   :  { %v2097_v15 = vpop.eup %2096 }
 0x6be   :  { %v705_v16 = vmul.f32 0.6931472, %v2097_v15 }
 0x6c0   :  { %v706_v17 = vadd.f32 %v705_v16, %v698_v62 }
 0x6c2   :  { %v2435_v18 = vadd.f32 1e-05, %v706_v17 }
 0x6c4   :  { %866 = vrot.lane.b32.xlu1 %v2435_v18, %s2162_s18  ;;  %2098 = vlog2.f32 %v2435_v18 }
 0x6c5   :  { %2100 = vpow2.f32 %v600_v44 }
 0x6d1   :  { %v2099_v11 = vpop.eup %2098 }
 0x6d2   :  { %v850_v19 = vmul.f32 0.6931472, %v2099_v11  ;;  %v2101_v54 = vpop.eup %2100 }
 0x6d3   :  { %v602_v48 = vadd.f32 1.0, %v2101_v54  ;;  %v2132_v54 = vld [vmem:[%s2546_s0] sm:$0xff] }
 0x6d4   :  { %v851_v20 = vmul.f32 0.5, %v850_v19 }
 0x6d6   :  { %871 = vrot.lane.b32.xlu1 %v851_v20, %s2162_s18 }
 0x75c   :  { %v2444_v25 = vpop.f32.mrf.mxu1 }
 0x75d   :  { %v797_v15 = vand.u32 2147483647, %v2444_v25 }
 0x75e   :  { %v2035_v27 = vpop.f32.mrf.mxu1 }
 0x75f   :  { %v798_v16 = vsub.f32 0.0, %v797_v15 }
 0x760   :  { %v1054_v30 = vpop.f32.mrf.mxu1 }
 0x761   :  { %v1058_v37 = vadd.f32 %v1054_v30, %v981_v28  ;;  %v1594_v30 = vsel %vm1150_vm6, 1.0, %v2158_v0 }
 0x762   :  { %v2045_v31 = vpop.f32.mrf.mxu1 }
 0x763   :  { %v1133_v33 = vmul.f32 -0.5, %v1058_v37 }
 0x765   :  { %v1134_v34 = vsel %vm2454_vm4, %v1133_v33, -inf }
 0x766   :  { %v1136_v35 = vsel %vm1135_vm5, %v1134_v34, -inf }
 0x767   :  { %1137 = vmax.xlane.f32.xlu0 %v1136_v35 }
 0x7f0   :  { %v1138_v42 = vpop.xlane.xlu0 %1137 }
 0x7f1   :  { %v1139_v43 = vsub.f32 %v1133_v33, %v1138_v42 }
 0x7f3   :  { %v1140_v45 = vsel %vm2454_vm4, %v1139_v43, 0.0  ;;  %v864_v43 = vmul.f32 %v863_v21, %v863_v21 }
 0x7f4   :  { %v1141_v47 = vmul.f32 1.442695, %v1140_v45 }
 0x7f6   :  { %2102 = vpow2.f32 %v1141_v47 }
 0x7f7   :  { %2104 = vpow2.f32 %v208_v53 }
 0x7f8   :  { %2106 = vlog2.f32 %v602_v48 }
 0x7f9   :  { %2108 = vlog2.f32 %v2331_v59  ;;  %v799_v59 = vmul.f32 1.442695, %v798_v16 }
 0x803   :  { %v2103_v58 = vpop.eup %2102 }
 0x804   :  { %v1143_v61 = vmul.f32 %v2103_v58, %v1132_v55  ;;  %v2476_v2 = vpop.eup %2104  ;;  %v795_v55 = vmul.f32 %v2132_v54, %v2444_v25 }
 0x805   :  { %v2107_v3 = vpop.eup %2106 }
 0x806   :  { %v1144_v62 = vmul.f32 %v2469_v60, %v1143_v61  ;;  %v604_v4 = vmul.f32 0.6931472, %v2107_v3  ;;  %v2109_v8 = vpop.eup %2108 }
 0x807   :  { %v812_v10 = vmul.f32 0.6931472, %v2109_v8 }
 0x808   :  { %v1145_v63 = vsel %vm1135_vm5, %v1144_v62, 0.0  ;;  %v605_v6 = vadd.f32 %v604_v4, %v597_v5 }
 0x809   :  { %1146 = vadd.xlane.f32.xlu0 %v1145_v63 }
 0x80a   :  { %v606_v7 = vadd.f32 1e-05, %v605_v6 }
 0x80c   :  { %2110 = vlog2.f32 %v606_v7 }
 0x80d   :  { %1233 = vadd.xlane.f32.xlu0 %v1232_v1  ;;  %2112 = vpow2.f32 %v799_v59 }
 0x811   :  { %210 = vadd.xlane.f32.xlu0 %v2476_v2 }
 0x819   :  { %v2111_v12 = vpop.eup %2110 }
 0x81a   :  { %v824_v13 = vmul.f32 0.6931472, %v2111_v12  ;;  %v2113_v17 = vpop.eup %2112 }
 0x827   :  { %844 = vrot.lane.b32.xlu0 %v2435_v18, %s2163_s19  ;;  %v801_v18 = vadd.f32 1.0, %v2113_v17  ;;  %v2165_v17 = vmov 0  }
 0x828   :  { %2087 = vset.pattern.permute.xlu0 %v2165_v17 }
 0x82b   :  { %837 = vrot.lane.b32.xlu0 %v2419_v14, %s2164_s20 }
 0x82f   :  { %853 = vrot.lane.b32.xlu0 %v851_v20, %s2163_s19  ;;  %v867_v20 = vpop.permute.xlu1 %866 }
 0x833   :  { %814 = vrot.lane.b32.xlu0 %v812_v10, %s2160_s17  ;;  %v872_v48 = vpop.permute.xlu1 %871 }
 0x837   :  { %826 = vrot.lane.b32.xlu0 %v824_v13, %s2164_s20 }
 0x892   :  { %v1147_v11 = vpop.xlane.xlu0 %1146 }
 0x893   :  { %2114 = vrcp.f32 %v1147_v11 }
 0x894   :  { %2116 = vlog2.f32 %v801_v18 }
 0x896   :  { %v1234_v19 = vpop.xlane.xlu0 %1233 }
 0x897   :  { %v1308_v31 = vsub.f32 %v1234_v19, %v2433_v9  ;;  %v796_v9 = vmax.f32 %v2444_v25, 0.0 }
 0x89a   :  { %v211_v22 = vpop.xlane.xlu0 %210 }
 0x89b   :  { %2118 = vlog2.f32 %v211_v22 }
 0x89c   :  { %2120 = vrcp.f32 %v211_v22 }
 0x89e   :  { %v845_v23 = vpop.permute.xlu0 %844 }
 0x89f   :  { %2122 = vrcp.f32 %v845_v23 }
 0x8a0   :  { %v2115_v24 = vpop.eup %2114  ;;  %2124 = vrcp.f32 %v867_v20 }
 0x8a1   :  { %v2487_v26 = vmul.f32 %v2115_v24, %v1144_v62  ;;  %v2117_v37 = vpop.eup %2116 }
 0x8a2   :  { %v838_v27 = vpop.permute.xlu0 %837  ;;  %v803_v35 = vmul.f32 0.6931472, %v2117_v37 }
 0x8a3   :  { %v840_v28 = vsub.f32 %v2320_v46, %v838_v27  ;;  %2052 = vmatpush3.xpose.msk.msra.mxu1 %vm1135_vm5, %v2487_v26 }
 0x8a4   :  { %2061 = vmatprep.subr.mxu1 %v2158_v0  ;;  %v804_v49 = vadd.f32 %v803_v35, %v796_v9 }
 0x8a5   :  { %v841_v34 = vmul.f32 %v840_v28, %v840_v28 }
 0x8a6   :  { %2054 = vmatmul.mubr.msk.f32.vlgmr.msra.gmra.mxu1 %vm1135_vm5, %v1594_v30  ;;  %v854_v33 = vpop.permute.xlu0 %853  ;;  %v805_v62 = vsub.f32 %v795_v55, %v804_v49 }
 0x8a7   :  { %2062 = vmatpush3.xpose.msk.msra.mxu1 %vm1135_vm5, %v1308_v31  ;;  %2063 = vmatprep.mubr.msk.f32.mxu1 %vm2159_vm0, %v2158_v0  ;;  %v842_v44 = vmul.f32 -0.5, %v841_v34 }
 0x8a8   :  { %v2119_v46 = vpop.eup %2118  ;;  %2071 = vmatprep.subr.mxu1 %v2158_v0 }
 0x8a9   :  { %v213_v36 = vmul.f32 0.6931472, %v2119_v46  ;;  %v2121_v41 = vpop.eup %2120 }
 0x8aa   :  { %v815_v42 = vpop.permute.xlu0 %814  ;;  %2064 = vmatmul.mubr.msk.f32.vlgmr.msra.gmra.mxu1 %vm1135_vm5, %v1594_v30  ;;  %v217_v52 = vmul.f32 %v2121_v41, %v2476_v2 }
 0x8ab   :  { %v818_v14 = vsel %vm817_vm11, %v815_v42, 0.0  ;;  %v214_v45 = vadd.f32 %v213_v36, %v2258_v56  ;;  %2073 = vmatprep.mubr.msk.f32.mxu1 %vm2159_vm0, %v2158_v0  ;;  %v865_v56 = vmul.f32 -0.5, %v864_v43  ;;  %vm806_vm0 = vcmask 523264  }
 0x8ac   :  { %v2123_v47 = vpop.eup %2122  ;;  %819 = vadd.xlane.f32.xlu0 %v818_v14  ;;  %v807_v3 = vsel %vm806_vm0, %v805_v62, 0.0  ;;  %v1585_v43 = vsel %vm2446_vm2, 1.0, %v2158_v0 }
 0x8ad   :  { %v848_v50 = vmul.f32 %v2123_v47, %v842_v44  ;;  %v2509_v51 = vsub.f32 %v2236_v39, %v214_v45  ;;  %v2125_v53 = vpop.eup %2124 }
 0x8ae   :  { %v870_v63 = vmul.f32 %v2125_v53, %v865_v56  ;;  %v827_v2 = vpop.permute.xlu0 %826 }
 0x8af   :  { %v856_v58 = vsub.f32 %v848_v50, %v854_v33  ;;  %v218_v61 = vmul.f32 %v217_v52, %v2509_v51  ;;  %v830_v25 = vsel %vm829_vm15, %v827_v2, 0.0  ;;  %v1561_v44 = vsel %vm203_vm1, %v2509_v51, 0.0 }
 0x8b0   :  { %v874_v39 = vsub.f32 %v870_v63, %v872_v48 }
 0x8b1   :  { %v1583_v40 = vadd.f32 -0.9189385, %v856_v58  ;;  %219 = vadd.xlane.f32.xlu1 %v218_v61 }
 0x8b2   :  { %v1584_v4 = vadd.f32 -0.9189385, %v874_v39 }
 0x8b3   :  { %v858_v1 = vsel %vm817_vm11, %v1583_v40, 0.0  ;;  %vm1563_vm11 = vcmp.lt.s32.totalorder %v2233_v38, 10 }
 0x8b4   :  { %859 = vadd.xlane.f32.xlu0 %v858_v1  ;;  %v876_v5 = vsel %vm829_vm15, %v1584_v4, 0.0  ;;  %vm1564_vm14 = vmand %vm1562_vm10, %vm1563_vm11 }
 0x8b5   :  { %808 = vadd.xlane.f32.xlu1 %v807_v3  ;;  %vm1569_vm15 = vmand %vm1567_vm12, %vm1568_vm13  ;;  %v1565_v29 = vsel %vm1564_vm14, %v2391_v57, 0.0 }
 0x8b6   :  { %v1566_v14 = vadd.f32 %v1565_v29, %v1561_v44 }
 0x8b8   :  { %831 = vadd.xlane.f32.xlu0 %v830_v25 }
 0x8bc   :  { %877 = vadd.xlane.f32.xlu0 %v876_v5 }
 0x935   :  { %v820_v11 = vpop.xlane.xlu0 %819 }
 0x936   :  { %v821_v23 = vmul.f32 -0.5, %v820_v11 }
 0x938   :  { %v1581_v27 = vadd.f32 -14.703016, %v821_v23 }
 0x93a   :  { %v220_v19 = vpop.xlane.xlu1 %219 }
 0x93b   :  { %v835_v22 = vadd.f32 2.0794415, %v220_v19 }
 0x93d   :  { %v860_v18 = vpop.xlane.xlu0 %859 }
 0x93e   :  { %v861_v24 = vsub.f32 %v835_v22, %v860_v18 }
 0x940   :  { %v862_v37 = vadd.f32 %v1581_v27, %v861_v24 }
 0x941   :  { %v832_v20 = vpop.xlane.xlu0 %831 }
 0x942   :  { %v833_v30 = vmul.f32 -0.5, %v832_v20 }
 0x945   :  { %v878_v28 = vpop.xlane.xlu0 %877 }
 0x946   :  { %v879_v33 = vsub.f32 %v862_v37, %v878_v28 }
 0x966   :  { %v1225_v6 = vpop.f32.mrf.mxu1 }
 0x967   :  { %v1229_v50 = vadd.f32 %v1225_v6, %v2487_v26 }
 0x968   :  { %v2055_v7 = vpop.f32.mrf.mxu1 }
 0x969   :  { %v1230_v52 = vmul.f32 0.0625, %v1229_v50 }
 0x96a   :  { %v1378_v8 = vpop.f32.mrf.mxu1 }
 0x96b   :  { %v1382_v10 = vadd.f32 %v1378_v8, %v1308_v31  ;;  %v809_v31 = vpop.xlane.xlu1 %808  ;;  %vm1479_vm2 = vcmp.gt.f32.partialorder %v1230_v52, 0.0 }
 0x96c   :  { %v2065_v12 = vpop.f32.mrf.mxu1  ;;  %v810_v21 = vsub.f32 0.0, %v809_v31  ;;  %vm1480_vm1 = vmand %vm2454_vm4, %vm1479_vm2 }
 0x96d   :  { %v1383_v13 = vadd.f32 1.0, %v1382_v10 }
 0x96e   :  { %v1393_v35 = vsel %vm1392_vm8, %v810_v21, 0.0 }
 0x96f   :  { %2126 = vrcp.f32 %v1383_v13 }
 0x97c   :  { %v2127_v15 = vpop.eup %2126 }
 0x97d   :  { %v1386_v16 = vmul.f32 %v2127_v15, %v2469_v60  ;;  %v1582_v60 = vadd.f32 -1.837877, %v833_v30  ;;  %2128 = vrcp.f32 %v2127_v15 }
 0x97f   :  { %v1387_v59 = vsel %vm1135_vm5, %v1386_v16, 0.0  ;;  %v880_v34 = vadd.f32 %v1582_v60, %v879_v33 }
 0x980   :  { %1388 = vadd.xlane.f32.xlu1 %v1387_v59 }
 0x981   :  { %v1396_v9 = vsel %vm1395_vm9, %v880_v34, 0.0 }
 0x98a   :  { %v2129_v55 = vpop.eup %2128 }
 0xa09   :  { %v1389_v46 = vpop.xlane.xlu1 %1388 }
 0xa0a   :  { %v1391_v36 = vsel %vm1390_vm7, %v1389_v46, 0.0 }
 0xa0b   :  { %v1394_v41 = vadd.f32 %v1393_v35, %v1391_v36 }
 0xa0d   :  { %v1397_v42 = vadd.f32 %v1396_v9, %v1394_v41 }
 0xa0f   :  { %2067 = vmatpush3.msra.mxu0 %v1397_v42 }
 0xa10   :  { %2069 = vmatmul.mubr.msk.f32.vlgmr.msra.gmra.mxu0 %vm1135_vm5, %v1585_v43 }
 0xad0   :  { %v1467_v0 = vpop.f32.mrf.mxu0 }
 0xad1   :  { %v1570_v45 = vsel %vm1569_vm15, %v1467_v0, 0.0  ;;  %1473 = vperm.xlu0 %2087, %v1467_v0  }
 0xad2   :  { %v1571_v47 = vadd.f32 %v1570_v45, %v1566_v14  ;;  %v2070_v49 = vpop.f32.mrf.mxu0 }
 0xb4c   :  { %v1474_v53 = vpop.permute.xlu0 %1473 }
 0xb4d   :  { %v1476_v54 = vmul.f32 %v1474_v53, %v1230_v52 }
 0xb4f   :  { %v1478_v56 = vmul.f32 %v2129_v55, %v1476_v54 }
 0xb51   :  { %v1481_v51 = vsel %vm1480_vm1, %v1478_v56, 1.0 }
 0xb52   :  { %2130 = vlog2.f32 %v1481_v51 }
 0xb5f   :  { %v2131_v57 = vpop.eup %2130 }
 0xb60   :  { %v1483_v58 = vmul.f32 0.6931472, %v2131_v57 }
 0xb62   :  { %v1484_v61 = vmul.f32 %v1483_v58, %v1230_v52 }
 0xb64   :  { %v1485_v48 = vsel %vm1480_vm1, %v1484_v61, 0.0 }
 0xb65   :  { %v1486_v62 = vsel %vm1135_vm5, %v1485_v48, 0.0 }
 0xb66   :  { %1487 = vadd.xlane.f32.xlu1 %v1486_v62 }
 0xbef   :  { %v1488_v26 = vpop.xlane.xlu1 %1487 }
 0xbf0   :  { %2072 = vmatpush3.msk.msra.mxu1 %vm1489_vm3, %v1488_v26 }
 0xbf1   :  { %2074 = vmatmul.mubr.msk.f32.vlgmr.msra.gmra.mxu1 %vm1135_vm5, %v1585_v43 }
 0xcb1   :  { %v1557_v63 = vpop.f32.mrf.mxu1 }
 0xcb2   :  { %v1572_v40 = vsel %vm1489_vm3, %v1557_v63, 0.0 }
 0xcb3   :  { %v1573_v39 = vadd.f32 %v1572_v40, %v1571_v47  ;;  %v2075_v32 = vpop.f32.mrf.mxu1 }
 0xcb5   :  { %1574 = vst [vmem:[%s2548_s2] sm:$0xff] %v1573_v39 }
 0xcb6   :  { %1579 = vsyncpa [#allocation3], 1 }

</bundles_post_ra>
